<compile_context>
chip_gen: v7x
topology: tpu7x:2x2x1
jax: 0.10.0
libtpu: 0.0.40
codegen_flags: <defaults>
</compile_context>

<pallas_src>
import jax
import jax.numpy as jnp
from jax.experimental import pallas as pl
from jax.experimental.pallas import tpu as pltpu


def _round_up(x, m):
    return ((x + m - 1) // m) * m


def _vmem_capacity_bytes():
    """Physical VMEM of the local chip (128 MiB v5e/v6e, 64 MiB/core v7x)."""
    try:
        cap = getattr(pltpu.get_tpu_info(), "vmem_capacity_bytes", None)
        if cap:
            return int(min(max(int(cap), 16 << 20), 128 << 20))
    except Exception:
        pass
    return 64 << 20  # conservative fallback (v7x per-core VMEM)


# ---------------------------------------------------------------------------
# Lane-dense (VPU) path for small C: precomputed per-lane weight tables.
# ---------------------------------------------------------------------------
def _conv3x3_lane_table(w, C, WC, WCP):
    """Per-lane weight vectors for the lane-dense 3x3 conv.

    Row (dy*nT + ti) holds, for output lane L = w*C + co, the weight applied
    to the lane-rolled tap xp[row, L + t] with t = ti - (2C-1).  Padding lanes
    (L >= WC) stay zero, so wrapped-in rolled data is always multiplied by 0.
    """
    nT = 4 * C - 1
    L = jnp.arange(WC)
    co = L % C
    T = jnp.zeros((3, nT, WCP), jnp.float32)
    for dy in range(3):
        for dx in range(3):
            for ci in range(C):
                ti = (dx - 1) * C + (ci - co) + (2 * C - 1)  # (WC,)
                T = T.at[dy, ti, L].add(w[dy, dx, ci, co])
    return T.reshape(3 * nT, WCP)


def _conv1x1_lane_table(w, C, WC, WCP):
    nT = 2 * C - 1
    L = jnp.arange(WC)
    co = L % C
    T = jnp.zeros((nT, WCP), jnp.float32)
    for ci in range(C):
        ti = (ci - co) + (C - 1)
        T = T.at[ti, L].add(w[ci, co])
    return T


def _bias_lane_vec(b, C, WC, WCP):
    bv = jnp.tile(jnp.reshape(b, (C,)), WC // C)          # lane L -> b[L % C]
    return jnp.pad(bv, (0, WCP - WC)).reshape(1, WCP)


def _make_vpu_kernel(C, H, WC, HP, WCP):
    nT = 4 * C - 1        # distinct lane shifts per dy row of the 3x3 table
    nT3 = 2 * C - 1       # lane shifts of the 1x1 conv

    def kernel(x_ref, wt1_ref, bv1_ref, wt2_ref, bv2_ref, wt3_ref, bv3_ref,
               o_ref, pad_ref):
        f32 = jnp.float32
        # Zero only the padding strips, once per grid step.  The data region
        # [0:H, 0:WC] is fully overwritten before every read below and the
        # padding is never written again, so it stays zero for all 3 convs.
        pad_ref[H:HP, :] = jnp.zeros((HP - H, WCP), f32)
        pad_ref[0:H, WC:WCP] = jnp.zeros((H, WCP - WC), f32)

        def conv3x3(src, wt_ref, bv_ref):
            # src: (H, WC) activation slab, channels innermost on lanes.
            pad_ref[0:H, 0:WC] = src                  # aligned (offset-0) store
            xp = pad_ref[...]                         # (HP, WCP), a few vregs
            q0 = q1 = q2 = None                       # per-dy partial sums
            for ti in range(nT):
                t = ti - (2 * C - 1)                  # tap lane = L + t
                tap = xp if t == 0 else pltpu.roll(xp, shift=(-t) % WCP, axis=1)
                c0 = tap * wt_ref[0 * nT + ti:0 * nT + ti + 1, :]
                c1 = tap * wt_ref[1 * nT + ti:1 * nT + ti + 1, :]
                c2 = tap * wt_ref[2 * nT + ti:2 * nT + ti + 1, :]
                q0 = c0 if q0 is None else q0 + c0
                q1 = c1 if q1 is None else q1 + c1
                q2 = c2 if q2 is None else q2 + c2
            # dy = 0 / 2 row taps as sublane rolls; the circular wrap brings
            # in the zeroed padding rows, i.e. the zero image border.
            acc = (q1 + pltpu.roll(q0, shift=1, axis=0)
                   + pltpu.roll(q2, shift=HP - 1, axis=0) + bv_ref[...])
            return acc[0:H, 0:WC]                     # aligned prefix slice

        def conv1x1(src, wt_ref, bv_ref):
            pad_ref[0:H, 0:WC] = src
            xp = pad_ref[...]
            acc = None
            for ti in range(nT3):
                t = ti - (C - 1)
                tap = xp if t == 0 else pltpu.roll(xp, shift=(-t) % WCP, axis=1)
                c = tap * wt_ref[ti:ti + 1, :]
                acc = c if acc is None else acc + c
            return (acc + bv_ref[...])[0:H, 0:WC]

        x = x_ref[0]                                             # (H, WC)
        h = jnp.maximum(conv3x3(x, wt1_ref, bv1_ref), 0.0)       # conv + ReLU
        h = jnp.maximum(conv3x3(h, wt2_ref, bv2_ref), 0.0)       # conv + ReLU
        o_ref[0] = conv1x1(h, wt3_ref, bv3_ref) + x              # 1x1 + skip

    return kernel


def _resblock_vpu(x_nhwc, w1, b1, w2, b2, w3, b3):
    N, H, W, C = x_nhwc.shape
    WC = W * C
    WCP = _round_up(WC + 2 * C, 128)   # >= C zero lanes right of the data
    HP = _round_up(H + 2, 8)           # >= 2 zero rows below the data
    nT = 4 * C - 1
    nT3 = 2 * C - 1

    wt1 = _conv3x3_lane_table(w1, C, WC, WCP)
    bv1 = _bias_lane_vec(b1, C, WC, WCP)
    wt2 = _conv3x3_lane_table(w2, C, WC, WCP)
    bv2 = _bias_lane_vec(b2, C, WC, WCP)
    wt3 = _conv1x1_lane_table(w3, C, WC, WCP)
    bv3 = _bias_lane_vec(b3, C, WC, WCP)

    x2d = x_nhwc.reshape(N, H, WC)     # free: NHWC is contiguous, C last

    flops = 2 * N * H * W * C * (9 * C + 9 * C + C)
    w_elems = (2 * 3 * nT + nT3 + 3) * WCP
    cost = pl.CostEstimate(flops=flops, transcendentals=0,
                           bytes_accessed=4 * (2 * N * H * WC + w_elems))

    need = 2 * (2 * H * WC + w_elems) * 4 + HP * WCP * 4
    vmem_limit = int(min(max(2 * need, 16 << 20), _vmem_capacity_bytes()))

    grid_spec = pltpu.PrefetchScalarGridSpec(
        num_scalar_prefetch=0,
        grid=(N,),
        in_specs=[
            pl.BlockSpec((1, H, WC), lambda n: (n, 0, 0)),        # x slab
            pl.BlockSpec((3 * nT, WCP), lambda n: (0, 0)),        # conv1 taps
            pl.BlockSpec((1, WCP), lambda n: (0, 0)),             # conv1 bias
            pl.BlockSpec((3 * nT, WCP), lambda n: (0, 0)),        # conv2 taps
            pl.BlockSpec((1, WCP), lambda n: (0, 0)),             # conv2 bias
            pl.BlockSpec((nT3, WCP), lambda n: (0, 0)),           # conv3 taps
            pl.BlockSpec((1, WCP), lambda n: (0, 0)),             # conv3 bias
        ],
        out_specs=pl.BlockSpec((1, H, WC), lambda n: (n, 0, 0)),  # lane-dense
        scratch_shapes=[pltpu.VMEM((HP, WCP), jnp.float32)],
    )
    out2d = pl.pallas_call(
        _make_vpu_kernel(C, H, WC, HP, WCP),
        out_shape=jax.ShapeDtypeStruct((N, H, WC), jnp.float32),
        grid_spec=grid_spec,
        compiler_params=pltpu.CompilerParams(
            dimension_semantics=("parallel",),        # disjoint outputs per n
            vmem_limit_bytes=vmem_limit),
        cost_estimate=cost,
    )(x2d, wt1, bv1, wt2, bv2, wt3, bv3)
    return out2d.reshape(N, H, W, C)


# ---------------------------------------------------------------------------
# MXU matmul path for production channel counts (C >= 128): bf16 operands,
# f32 accumulation, per-band ref loads inside the tap loop.
# ---------------------------------------------------------------------------
def _make_mxu_kernel(H, W, C, WP, compute_dtype):
    def kernel(x_ref, w1_ref, b1_ref, w2_ref, b2_ref, w3_ref, b3_ref,
               o_ref, pad_ref):
        # Zero only the halo ring / width padding, once per grid step.
        pad_ref[0:1, :, :] = jnp.zeros((1, WP, C), jnp.float32)
        pad_ref[H + 1:H + 2, :, :] = jnp.zeros((1, WP, C), jnp.float32)
        pad_ref[1:H + 1, 0:1, :] = jnp.zeros((H, 1, C), jnp.float32)
        pad_ref[1:H + 1, W + 1:WP, :] = jnp.zeros((H, WP - W - 1, C),
                                                  jnp.float32)
        x = x_ref[0]

        def conv3x3(src_hwc, w_ref, b_ref):
            pad_ref[1:H + 1, 1:W + 1, :] = src_hwc
            out = jnp.broadcast_to(b_ref[...], (H, W, C)).astype(jnp.float32)
            for dx in range(3):
                acc = None
                for dy in range(3):
                    band = pad_ref[dy:dy + H].reshape(H * WP, C)
                    d = jnp.dot(band.astype(compute_dtype),
                                w_ref[dy, dx].astype(compute_dtype),
                                preferred_element_type=jnp.float32)
                    acc = d if acc is None else acc + d
                out = out + acc.reshape(H, WP, C)[:, dx:dx + W, :]
            return out

        h = jnp.maximum(conv3x3(x, w1_ref, b1_ref), 0.0)
        h = jnp.maximum(conv3x3(h, w2_ref, b2_ref), 0.0)
        y = jnp.dot(h.reshape(H * W, C).astype(compute_dtype),
                    w3_ref[...].astype(compute_dtype),
                    preferred_element_type=jnp.float32) + b3_ref[...]
        o_ref[0] = y.reshape(H, W, C) + x
    return kernel


def _resblock_mxu(x_nhwc, w1, b1, w2, b2, w3, b3):
    N, H, W, C = x_nhwc.shape
    assert W % 8 == 0, "W must be a multiple of 8 for layout-free reshapes"
    WP = ((W + 2 + 7) // 8) * 8
    compute_dtype = jnp.bfloat16 if C >= 128 else jnp.float32

    flops = 2 * N * H * W * C * (9 * C + 9 * C + C)
    bytes_accessed = 4 * (2 * N * H * W * C + 2 * 9 * C * C + C * C + 3 * C)
    cost = pl.CostEstimate(flops=flops, transcendentals=0,
                           bytes_accessed=bytes_accessed)

    blk_bytes = H * W * C * 4
    w_bytes = (2 * 9 * C * C + C * C + 3 * C) * 4
    pad_bytes = (H + 2) * WP * C * 4
    need = 4 * blk_bytes + 2 * w_bytes + pad_bytes
    vmem_limit = int(min(max(2 * need, 16 << 20), _vmem_capacity_bytes()))

    grid_spec = pltpu.PrefetchScalarGridSpec(
        num_scalar_prefetch=0,
        grid=(N,),
        in_specs=[
            pl.BlockSpec((1, H, W, C), lambda n: (n, 0, 0, 0)),   # x
            pl.BlockSpec((3, 3, C, C), lambda n: (0, 0, 0, 0)),   # w1
            pl.BlockSpec((1, C), lambda n: (0, 0)),               # b1
            pl.BlockSpec((3, 3, C, C), lambda n: (0, 0, 0, 0)),   # w2
            pl.BlockSpec((1, C), lambda n: (0, 0)),               # b2
            pl.BlockSpec((C, C), lambda n: (0, 0)),               # w3
            pl.BlockSpec((1, C), lambda n: (0, 0)),               # b3
        ],
        out_specs=pl.BlockSpec((1, H, W, C), lambda n: (n, 0, 0, 0)),
        scratch_shapes=[pltpu.VMEM((H + 2, WP, C), jnp.float32)],
    )
    return pl.pallas_call(
        _make_mxu_kernel(H, W, C, WP, compute_dtype),
        out_shape=jax.ShapeDtypeStruct((N, H, W, C), jnp.float32),
        grid_spec=grid_spec,
        compiler_params=pltpu.CompilerParams(
            dimension_semantics=("parallel",),
            vmem_limit_bytes=vmem_limit),
        cost_estimate=cost,
    )(x_nhwc, w1, b1, w2, b2, w3, b3)


def resblock_pallas(x_nhwc, w1, b1, w2, b2, w3, b3):
    C = x_nhwc.shape[-1]
    if C >= 128:
        return _resblock_mxu(x_nhwc, w1, b1, w2, b2, w3, b3)
    return _resblock_vpu(x_nhwc, w1, b1, w2, b2, w3, b3)


def resblock_ref(x_nhwc, w1, b1, w2, b2, w3, b3):
    # Pure-JAX reference (same semantics as the PyTorch module, NHWC layout).
    C = x_nhwc.shape[-1]

    def conv(h, w, b, same):
        return jax.lax.conv_general_dilated(
            h, w, window_strides=(1, 1),
            padding="SAME" if same else "VALID",
            dimension_numbers=("NHWC", "HWIO", "NHWC")) + b

    h = jax.nn.relu(conv(x_nhwc, w1, b1, True))
    h = jax.nn.relu(conv(h, w2, b2, True))
    h = conv(h, w3.reshape(1, 1, C, C), b3, False)
    return h + x_nhwc


if __name__ == "__main__":
    N, C, H, W = 2, 4, 16, 16
    key = jax.random.PRNGKey(0)
    kx, k1, k2, k3, kb1, kb2, kb3 = jax.random.split(key, 7)

    # Deterministic synthetic parameters (ResBlock(chan=C)).
    w1 = jax.random.normal(k1, (3, 3, C, C), jnp.float32) * 0.1   # conv3x3 #1
    b1 = jax.random.normal(kb1, (1, C), jnp.float32) * 0.1
    w2 = jax.random.normal(k2, (3, 3, C, C), jnp.float32) * 0.1   # conv3x3 #2
    b2 = jax.random.normal(kb2, (1, C), jnp.float32) * 0.1
    w3 = jax.random.normal(k3, (C, C), jnp.float32) * 0.1         # conv1x1
    b3 = jax.random.normal(kb3, (1, C), jnp.float32) * 0.1

    # Input in PyTorch NCHW convention, transposed to the kernel's NHWC layout.
    x_nchw = jax.random.normal(kx, (N, C, H, W), jnp.float32)
    x_nhwc = jnp.transpose(x_nchw, (0, 2, 3, 1))

    out = resblock_pallas(x_nhwc, w1, b1, w2, b2, w3, b3)
    out = jax.block_until_ready(out)

    ref = resblock_ref(x_nhwc, w1, b1, w2, b2, w3, b3)
    assert out.shape == (N, H, W, C)
    assert jnp.max(jnp.abs(out - ref)) < 1e-4, "mismatch vs JAX reference"

    print("KERNEL_OK")
</pallas_src>

<mosaic_0001>
module attributes {stable_mosaic.version = 11 : i64} {
  func.func @kernel(%arg0: i32, %arg1: memref<1x16x64xf32, #tpu.memory_space<vmem>>, %arg2: memref<45x128xf32, #tpu.memory_space<vmem>>, %arg3: memref<1x128xf32, #tpu.memory_space<vmem>>, %arg4: memref<45x128xf32, #tpu.memory_space<vmem>>, %arg5: memref<1x128xf32, #tpu.memory_space<vmem>>, %arg6: memref<7x128xf32, #tpu.memory_space<vmem>>, %arg7: memref<1x128xf32, #tpu.memory_space<vmem>>, %arg8: memref<1x16x64xf32, #tpu.memory_space<vmem>>, %arg9: memref<24x128xf32, #tpu.memory_space<vmem>>) attributes {dimension_semantics = [#tpu.dimension_semantics<parallel>], iteration_bounds = array<i64: 2>, scalar_prefetch = 0 : i64, scratch_operands = 1 : i64, tpu.core_type = #tpu.core_type<tc>, window_params = [{transform_indices = @transform_0, window_bounds = array<i64: 1, 16, 64>}, {pipeline_mode = #tpu.pipeline_mode<synchronous>, transform_indices = @transform_1, window_bounds = array<i64: 45, 128>}, {pipeline_mode = #tpu.pipeline_mode<synchronous>, transform_indices = @transform_2, window_bounds = array<i64: 1, 128>}, {pipeline_mode = #tpu.pipeline_mode<synchronous>, transform_indices = @transform_3, window_bounds = array<i64: 45, 128>}, {pipeline_mode = #tpu.pipeline_mode<synchronous>, transform_indices = @transform_4, window_bounds = array<i64: 1, 128>}, {pipeline_mode = #tpu.pipeline_mode<synchronous>, transform_indices = @transform_5, window_bounds = array<i64: 7, 128>}, {pipeline_mode = #tpu.pipeline_mode<synchronous>, transform_indices = @transform_6, window_bounds = array<i64: 1, 128>}, {transform_indices = @transform_7, window_bounds = array<i64: 1, 16, 64>}]} {
    %cst = arith.constant 0.000000e+00 : f32
    %0 = vector.broadcast %cst : f32 to vector<8x128xf32>
    %c16 = arith.constant 16 : index
    %c0 = arith.constant 0 : index
    %1 = vector.load %arg9[%c16, %c0] : memref<24x128xf32, #tpu.memory_space<vmem>>, vector<8x128xf32>
    tpu.vector_store %arg9[%c16, %c0], %0 {strides = array<i32>} : memref<24x128xf32, #tpu.memory_space<vmem>>, vector<8x128xf32>,
    %cst_0 = arith.constant 0.000000e+00 : f32
    %2 = vector.broadcast %cst_0 : f32 to vector<16x64xf32>
    %c0_1 = arith.constant 0 : index
    %c64 = arith.constant 64 : index
    %3 = vector.load %arg9[%c0_1, %c64] : memref<24x128xf32, #tpu.memory_space<vmem>>, vector<16x64xf32>
    tpu.vector_store %arg9[%c0_1, %c64], %2 {strides = array<i32>} : memref<24x128xf32, #tpu.memory_space<vmem>>, vector<16x64xf32>,
    %c0_2 = arith.constant 0 : index
    %c0_3 = arith.constant 0 : index
    %c0_4 = arith.constant 0 : index
    %4 = vector.load %arg1[%c0_2, %c0_3, %c0_4] : memref<1x16x64xf32, #tpu.memory_space<vmem>>, vector<1x16x64xf32>
    %5 = vector.shape_cast %4 : vector<1x16x64xf32> to vector<16x64xf32>
    %c0_5 = arith.constant 0 : index
    %c0_6 = arith.constant 0 : index
    %6 = vector.load %arg9[%c0_5, %c0_6] : memref<24x128xf32, #tpu.memory_space<vmem>>, vector<16x64xf32>
    tpu.vector_store %arg9[%c0_5, %c0_6], %5 {strides = array<i32>} : memref<24x128xf32, #tpu.memory_space<vmem>>, vector<16x64xf32>,
    %c0_7 = arith.constant 0 : index
    %c0_8 = arith.constant 0 : index
    %7 = vector.load %arg9[%c0_7, %c0_8] : memref<24x128xf32, #tpu.memory_space<vmem>>, vector<24x128xf32>
    %c7_i32 = arith.constant 7 : i32
    %8 = tpu.dynamic_rotate %7 by %c7_i32 dim 1 : vector<24x128xf32>, i32 -> vector<24x128xf32>
    %c0_9 = arith.constant 0 : index
    %c0_10 = arith.constant 0 : index
    %9 = vector.load %arg2[%c0_9, %c0_10] : memref<45x128xf32, #tpu.memory_space<vmem>>, vector<1x128xf32>
    %10 = vector.broadcast %9 : vector<1x128xf32> to vector<24x128xf32>
    %11 = arith.mulf %8, %10 : vector<24x128xf32>
    %c15 = arith.constant 15 : index
    %c0_11 = arith.constant 0 : index
    %12 = vector.load %arg2[%c15, %c0_11] : memref<45x128xf32, #tpu.memory_space<vmem>>, vector<1x128xf32>
    %13 = vector.broadcast %12 : vector<1x128xf32> to vector<24x128xf32>
    %14 = arith.mulf %8, %13 : vector<24x128xf32>
    %c30 = arith.constant 30 : index
    %c0_12 = arith.constant 0 : index
    %15 = vector.load %arg2[%c30, %c0_12] : memref<45x128xf32, #tpu.memory_space<vmem>>, vector<1x128xf32>
    %16 = vector.broadcast %15 : vector<1x128xf32> to vector<24x128xf32>
    %17 = arith.mulf %8, %16 : vector<24x128xf32>
    %c6_i32 = arith.constant 6 : i32
    %18 = tpu.dynamic_rotate %7 by %c6_i32 dim 1 : vector<24x128xf32>, i32 -> vector<24x128xf32>
    %c1 = arith.constant 1 : index
    %c0_13 = arith.constant 0 : index
    %19 = vector.load %arg2[%c1, %c0_13] : memref<45x128xf32, #tpu.memory_space<vmem>>, vector<1x128xf32>
    %20 = vector.broadcast %19 : vector<1x128xf32> to vector<24x128xf32>
    %21 = arith.mulf %18, %20 : vector<24x128xf32>
    %c16_14 = arith.constant 16 : index
    %c0_15 = arith.constant 0 : index
    %22 = vector.load %arg2[%c16_14, %c0_15] : memref<45x128xf32, #tpu.memory_space<vmem>>, vector<1x128xf32>
    %23 = vector.broadcast %22 : vector<1x128xf32> to vector<24x128xf32>
    %24 = arith.mulf %18, %23 : vector<24x128xf32>
    %c31 = arith.constant 31 : index
    %c0_16 = arith.constant 0 : index
    %25 = vector.load %arg2[%c31, %c0_16] : memref<45x128xf32, #tpu.memory_space<vmem>>, vector<1x128xf32>
    %26 = vector.broadcast %25 : vector<1x128xf32> to vector<24x128xf32>
    %27 = arith.mulf %18, %26 : vector<24x128xf32>
    %28 = arith.addf %11, %21 : vector<24x128xf32>
    %29 = arith.addf %14, %24 : vector<24x128xf32>
    %30 = arith.addf %17, %27 : vector<24x128xf32>
    %c5_i32 = arith.constant 5 : i32
    %31 = tpu.dynamic_rotate %7 by %c5_i32 dim 1 : vector<24x128xf32>, i32 -> vector<24x128xf32>
    %c2 = arith.constant 2 : index
    %c0_17 = arith.constant 0 : index
    %32 = vector.load %arg2[%c2, %c0_17] : memref<45x128xf32, #tpu.memory_space<vmem>>, vector<1x128xf32>
    %33 = vector.broadcast %32 : vector<1x128xf32> to vector<24x128xf32>
    %34 = arith.mulf %31, %33 : vector<24x128xf32>
    %c17 = arith.constant 17 : index
    %c0_18 = arith.constant 0 : index
    %35 = vector.load %arg2[%c17, %c0_18] : memref<45x128xf32, #tpu.memory_space<vmem>>, vector<1x128xf32>
    %36 = vector.broadcast %35 : vector<1x128xf32> to vector<24x128xf32>
    %37 = arith.mulf %31, %36 : vector<24x128xf32>
    %c32 = arith.constant 32 : index
    %c0_19 = arith.constant 0 : index
    %38 = vector.load %arg2[%c32, %c0_19] : memref<45x128xf32, #tpu.memory_space<vmem>>, vector<1x128xf32>
    %39 = vector.broadcast %38 : vector<1x128xf32> to vector<24x128xf32>
    %40 = arith.mulf %31, %39 : vector<24x128xf32>
    %41 = arith.addf %28, %34 : vector<24x128xf32>
    %42 = arith.addf %29, %37 : vector<24x128xf32>
    %43 = arith.addf %30, %40 : vector<24x128xf32>
    %c4_i32 = arith.constant 4 : i32
    %44 = tpu.dynamic_rotate %7 by %c4_i32 dim 1 : vector<24x128xf32>, i32 -> vector<24x128xf32>
    %c3 = arith.constant 3 : index
    %c0_20 = arith.constant 0 : index
    %45 = vector.load %arg2[%c3, %c0_20] : memref<45x128xf32, #tpu.memory_space<vmem>>, vector<1x128xf32>
    %46 = vector.broadcast %45 : vector<1x128xf32> to vector<24x128xf32>
    %47 = arith.mulf %44, %46 : vector<24x128xf32>
    %c18 = arith.constant 18 : index
    %c0_21 = arith.constant 0 : index
    %48 = vector.load %arg2[%c18, %c0_21] : memref<45x128xf32, #tpu.memory_space<vmem>>, vector<1x128xf32>
    %49 = vector.broadcast %48 : vector<1x128xf32> to vector<24x128xf32>
    %50 = arith.mulf %44, %49 : vector<24x128xf32>
    %c33 = arith.constant 33 : index
    %c0_22 = arith.constant 0 : index
    %51 = vector.load %arg2[%c33, %c0_22] : memref<45x128xf32, #tpu.memory_space<vmem>>, vector<1x128xf32>
    %52 = vector.broadcast %51 : vector<1x128xf32> to vector<24x128xf32>
    %53 = arith.mulf %44, %52 : vector<24x128xf32>
    %54 = arith.addf %41, %47 : vector<24x128xf32>
    %55 = arith.addf %42, %50 : vector<24x128xf32>
    %56 = arith.addf %43, %53 : vector<24x128xf32>
    %c3_i32 = arith.constant 3 : i32
    %57 = tpu.dynamic_rotate %7 by %c3_i32 dim 1 : vector<24x128xf32>, i32 -> vector<24x128xf32>
    %c4 = arith.constant 4 : index
    %c0_23 = arith.constant 0 : index
    %58 = vector.load %arg2[%c4, %c0_23] : memref<45x128xf32, #tpu.memory_space<vmem>>, vector<1x128xf32>
    %59 = vector.broadcast %58 : vector<1x128xf32> to vector<24x128xf32>
    %60 = arith.mulf %57, %59 : vector<24x128xf32>
    %c19 = arith.constant 19 : index
    %c0_24 = arith.constant 0 : index
    %61 = vector.load %arg2[%c19, %c0_24] : memref<45x128xf32, #tpu.memory_space<vmem>>, vector<1x128xf32>
    %62 = vector.broadcast %61 : vector<1x128xf32> to vector<24x128xf32>
    %63 = arith.mulf %57, %62 : vector<24x128xf32>
    %c34 = arith.constant 34 : index
    %c0_25 = arith.constant 0 : index
    %64 = vector.load %arg2[%c34, %c0_25] : memref<45x128xf32, #tpu.memory_space<vmem>>, vector<1x128xf32>
    %65 = vector.broadcast %64 : vector<1x128xf32> to vector<24x128xf32>
    %66 = arith.mulf %57, %65 : vector<24x128xf32>
    %67 = arith.addf %54, %60 : vector<24x128xf32>
    %68 = arith.addf %55, %63 : vector<24x128xf32>
    %69 = arith.addf %56, %66 : vector<24x128xf32>
    %c2_i32 = arith.constant 2 : i32
    %70 = tpu.dynamic_rotate %7 by %c2_i32 dim 1 : vector<24x128xf32>, i32 -> vector<24x128xf32>
    %c5 = arith.constant 5 : index
    %c0_26 = arith.constant 0 : index
    %71 = vector.load %arg2[%c5, %c0_26] : memref<45x128xf32, #tpu.memory_space<vmem>>, vector<1x128xf32>
    %72 = vector.broadcast %71 : vector<1x128xf32> to vector<24x128xf32>
    %73 = arith.mulf %70, %72 : vector<24x128xf32>
    %c20 = arith.constant 20 : index
    %c0_27 = arith.constant 0 : index
    %74 = vector.load %arg2[%c20, %c0_27] : memref<45x128xf32, #tpu.memory_space<vmem>>, vector<1x128xf32>
    %75 = vector.broadcast %74 : vector<1x128xf32> to vector<24x128xf32>
    %76 = arith.mulf %70, %75 : vector<24x128xf32>
    %c35 = arith.constant 35 : index
    %c0_28 = arith.constant 0 : index
    %77 = vector.load %arg2[%c35, %c0_28] : memref<45x128xf32, #tpu.memory_space<vmem>>, vector<1x128xf32>
    %78 = vector.broadcast %77 : vector<1x128xf32> to vector<24x128xf32>
    %79 = arith.mulf %70, %78 : vector<24x128xf32>
    %80 = arith.addf %67, %73 : vector<24x128xf32>
    %81 = arith.addf %68, %76 : vector<24x128xf32>
    %82 = arith.addf %69, %79 : vector<24x128xf32>
    %c1_i32 = arith.constant 1 : i32
    %83 = tpu.dynamic_rotate %7 by %c1_i32 dim 1 : vector<24x128xf32>, i32 -> vector<24x128xf32>
    %c6 = arith.constant 6 : index
    %c0_29 = arith.constant 0 : index
    %84 = vector.load %arg2[%c6, %c0_29] : memref<45x128xf32, #tpu.memory_space<vmem>>, vector<1x128xf32>
    %85 = vector.broadcast %84 : vector<1x128xf32> to vector<24x128xf32>
    %86 = arith.mulf %83, %85 : vector<24x128xf32>
    %c21 = arith.constant 21 : index
    %c0_30 = arith.constant 0 : index
    %87 = vector.load %arg2[%c21, %c0_30] : memref<45x128xf32, #tpu.memory_space<vmem>>, vector<1x128xf32>
    %88 = vector.broadcast %87 : vector<1x128xf32> to vector<24x128xf32>
    %89 = arith.mulf %83, %88 : vector<24x128xf32>
    %c36 = arith.constant 36 : index
    %c0_31 = arith.constant 0 : index
    %90 = vector.load %arg2[%c36, %c0_31] : memref<45x128xf32, #tpu.memory_space<vmem>>, vector<1x128xf32>
    %91 = vector.broadcast %90 : vector<1x128xf32> to vector<24x128xf32>
    %92 = arith.mulf %83, %91 : vector<24x128xf32>
    %93 = arith.addf %80, %86 : vector<24x128xf32>
    %94 = arith.addf %81, %89 : vector<24x128xf32>
    %95 = arith.addf %82, %92 : vector<24x128xf32>
    %c7 = arith.constant 7 : index
    %c0_32 = arith.constant 0 : index
    %96 = vector.load %arg2[%c7, %c0_32] : memref<45x128xf32, #tpu.memory_space<vmem>>, vector<1x128xf32>
    %97 = vector.broadcast %96 : vector<1x128xf32> to vector<24x128xf32>
    %98 = arith.mulf %7, %97 : vector<24x128xf32>
    %c22 = arith.constant 22 : index
    %c0_33 = arith.constant 0 : index
    %99 = vector.load %arg2[%c22, %c0_33] : memref<45x128xf32, #tpu.memory_space<vmem>>, vector<1x128xf32>
    %100 = vector.broadcast %99 : vector<1x128xf32> to vector<24x128xf32>
    %101 = arith.mulf %7, %100 : vector<24x128xf32>
    %c37 = arith.constant 37 : index
    %c0_34 = arith.constant 0 : index
    %102 = vector.load %arg2[%c37, %c0_34] : memref<45x128xf32, #tpu.memory_space<vmem>>, vector<1x128xf32>
    %103 = vector.broadcast %102 : vector<1x128xf32> to vector<24x128xf32>
    %104 = arith.mulf %7, %103 : vector<24x128xf32>
    %105 = arith.addf %93, %98 : vector<24x128xf32>
    %106 = arith.addf %94, %101 : vector<24x128xf32>
    %107 = arith.addf %95, %104 : vector<24x128xf32>
    %c127_i32 = arith.constant 127 : i32
    %108 = tpu.dynamic_rotate %7 by %c127_i32 dim 1 : vector<24x128xf32>, i32 -> vector<24x128xf32>
    %c8 = arith.constant 8 : index
    %c0_35 = arith.constant 0 : index
    %109 = vector.load %arg2[%c8, %c0_35] : memref<45x128xf32, #tpu.memory_space<vmem>>, vector<1x128xf32>
    %110 = vector.broadcast %109 : vector<1x128xf32> to vector<24x128xf32>
    %111 = arith.mulf %108, %110 : vector<24x128xf32>
    %c23 = arith.constant 23 : index
    %c0_36 = arith.constant 0 : index
    %112 = vector.load %arg2[%c23, %c0_36] : memref<45x128xf32, #tpu.memory_space<vmem>>, vector<1x128xf32>
    %113 = vector.broadcast %112 : vector<1x128xf32> to vector<24x128xf32>
    %114 = arith.mulf %108, %113 : vector<24x128xf32>
    %c38 = arith.constant 38 : index
    %c0_37 = arith.constant 0 : index
    %115 = vector.load %arg2[%c38, %c0_37] : memref<45x128xf32, #tpu.memory_space<vmem>>, vector<1x128xf32>
    %116 = vector.broadcast %115 : vector<1x128xf32> to vector<24x128xf32>
    %117 = arith.mulf %108, %116 : vector<24x128xf32>
    %118 = arith.addf %105, %111 : vector<24x128xf32>
    %119 = arith.addf %106, %114 : vector<24x128xf32>
    %120 = arith.addf %107, %117 : vector<24x128xf32>
    %c126_i32 = arith.constant 126 : i32
    %121 = tpu.dynamic_rotate %7 by %c126_i32 dim 1 : vector<24x128xf32>, i32 -> vector<24x128xf32>
    %c9 = arith.constant 9 : index
    %c0_38 = arith.constant 0 : index
    %122 = vector.load %arg2[%c9, %c0_38] : memref<45x128xf32, #tpu.memory_space<vmem>>, vector<1x128xf32>
    %123 = vector.broadcast %122 : vector<1x128xf32> to vector<24x128xf32>
    %124 = arith.mulf %121, %123 : vector<24x128xf32>
    %c24 = arith.constant 24 : index
    %c0_39 = arith.constant 0 : index
    %125 = vector.load %arg2[%c24, %c0_39] : memref<45x128xf32, #tpu.memory_space<vmem>>, vector<1x128xf32>
    %126 = vector.broadcast %125 : vector<1x128xf32> to vector<24x128xf32>
    %127 = arith.mulf %121, %126 : vector<24x128xf32>
    %c39 = arith.constant 39 : index
    %c0_40 = arith.constant 0 : index
    %128 = vector.load %arg2[%c39, %c0_40] : memref<45x128xf32, #tpu.memory_space<vmem>>, vector<1x128xf32>
    %129 = vector.broadcast %128 : vector<1x128xf32> to vector<24x128xf32>
    %130 = arith.mulf %121, %129 : vector<24x128xf32>
    %131 = arith.addf %118, %124 : vector<24x128xf32>
    %132 = arith.addf %119, %127 : vector<24x128xf32>
    %133 = arith.addf %120, %130 : vector<24x128xf32>
    %c125_i32 = arith.constant 125 : i32
    %134 = tpu.dynamic_rotate %7 by %c125_i32 dim 1 : vector<24x128xf32>, i32 -> vector<24x128xf32>
    %c10 = arith.constant 10 : index
    %c0_41 = arith.constant 0 : index
    %135 = vector.load %arg2[%c10, %c0_41] : memref<45x128xf32, #tpu.memory_space<vmem>>, vector<1x128xf32>
    %136 = vector.broadcast %135 : vector<1x128xf32> to vector<24x128xf32>
    %137 = arith.mulf %134, %136 : vector<24x128xf32>
    %c25 = arith.constant 25 : index
    %c0_42 = arith.constant 0 : index
    %138 = vector.load %arg2[%c25, %c0_42] : memref<45x128xf32, #tpu.memory_space<vmem>>, vector<1x128xf32>
    %139 = vector.broadcast %138 : vector<1x128xf32> to vector<24x128xf32>
    %140 = arith.mulf %134, %139 : vector<24x128xf32>
    %c40 = arith.constant 40 : index
    %c0_43 = arith.constant 0 : index
    %141 = vector.load %arg2[%c40, %c0_43] : memref<45x128xf32, #tpu.memory_space<vmem>>, vector<1x128xf32>
    %142 = vector.broadcast %141 : vector<1x128xf32> to vector<24x128xf32>
    %143 = arith.mulf %134, %142 : vector<24x128xf32>
    %144 = arith.addf %131, %137 : vector<24x128xf32>
    %145 = arith.addf %132, %140 : vector<24x128xf32>
    %146 = arith.addf %133, %143 : vector<24x128xf32>
    %c124_i32 = arith.constant 124 : i32
    %147 = tpu.dynamic_rotate %7 by %c124_i32 dim 1 : vector<24x128xf32>, i32 -> vector<24x128xf32>
    %c11 = arith.constant 11 : index
    %c0_44 = arith.constant 0 : index
    %148 = vector.load %arg2[%c11, %c0_44] : memref<45x128xf32, #tpu.memory_space<vmem>>, vector<1x128xf32>
    %149 = vector.broadcast %148 : vector<1x128xf32> to vector<24x128xf32>
    %150 = arith.mulf %147, %149 : vector<24x128xf32>
    %c26 = arith.constant 26 : index
    %c0_45 = arith.constant 0 : index
    %151 = vector.load %arg2[%c26, %c0_45] : memref<45x128xf32, #tpu.memory_space<vmem>>, vector<1x128xf32>
    %152 = vector.broadcast %151 : vector<1x128xf32> to vector<24x128xf32>
    %153 = arith.mulf %147, %152 : vector<24x128xf32>
    %c41 = arith.constant 41 : index
    %c0_46 = arith.constant 0 : index
    %154 = vector.load %arg2[%c41, %c0_46] : memref<45x128xf32, #tpu.memory_space<vmem>>, vector<1x128xf32>
    %155 = vector.broadcast %154 : vector<1x128xf32> to vector<24x128xf32>
    %156 = arith.mulf %147, %155 : vector<24x128xf32>
    %157 = arith.addf %144, %150 : vector<24x128xf32>
    %158 = arith.addf %145, %153 : vector<24x128xf32>
    %159 = arith.addf %146, %156 : vector<24x128xf32>
    %c123_i32 = arith.constant 123 : i32
    %160 = tpu.dynamic_rotate %7 by %c123_i32 dim 1 : vector<24x128xf32>, i32 -> vector<24x128xf32>
    %c12 = arith.constant 12 : index
    %c0_47 = arith.constant 0 : index
    %161 = vector.load %arg2[%c12, %c0_47] : memref<45x128xf32, #tpu.memory_space<vmem>>, vector<1x128xf32>
    %162 = vector.broadcast %161 : vector<1x128xf32> to vector<24x128xf32>
    %163 = arith.mulf %160, %162 : vector<24x128xf32>
    %c27 = arith.constant 27 : index
    %c0_48 = arith.constant 0 : index
    %164 = vector.load %arg2[%c27, %c0_48] : memref<45x128xf32, #tpu.memory_space<vmem>>, vector<1x128xf32>
    %165 = vector.broadcast %164 : vector<1x128xf32> to vector<24x128xf32>
    %166 = arith.mulf %160, %165 : vector<24x128xf32>
    %c42 = arith.constant 42 : index
    %c0_49 = arith.constant 0 : index
    %167 = vector.load %arg2[%c42, %c0_49] : memref<45x128xf32, #tpu.memory_space<vmem>>, vector<1x128xf32>
    %168 = vector.broadcast %167 : vector<1x128xf32> to vector<24x128xf32>
    %169 = arith.mulf %160, %168 : vector<24x128xf32>
    %170 = arith.addf %157, %163 : vector<24x128xf32>
    %171 = arith.addf %158, %166 : vector<24x128xf32>
    %172 = arith.addf %159, %169 : vector<24x128xf32>
    %c122_i32 = arith.constant 122 : i32
    %173 = tpu.dynamic_rotate %7 by %c122_i32 dim 1 : vector<24x128xf32>, i32 -> vector<24x128xf32>
    %c13 = arith.constant 13 : index
    %c0_50 = arith.constant 0 : index
    %174 = vector.load %arg2[%c13, %c0_50] : memref<45x128xf32, #tpu.memory_space<vmem>>, vector<1x128xf32>
    %175 = vector.broadcast %174 : vector<1x128xf32> to vector<24x128xf32>
    %176 = arith.mulf %173, %175 : vector<24x128xf32>
    %c28 = arith.constant 28 : index
    %c0_51 = arith.constant 0 : index
    %177 = vector.load %arg2[%c28, %c0_51] : memref<45x128xf32, #tpu.memory_space<vmem>>, vector<1x128xf32>
    %178 = vector.broadcast %177 : vector<1x128xf32> to vector<24x128xf32>
    %179 = arith.mulf %173, %178 : vector<24x128xf32>
    %c43 = arith.constant 43 : index
    %c0_52 = arith.constant 0 : index
    %180 = vector.load %arg2[%c43, %c0_52] : memref<45x128xf32, #tpu.memory_space<vmem>>, vector<1x128xf32>
    %181 = vector.broadcast %180 : vector<1x128xf32> to vector<24x128xf32>
    %182 = arith.mulf %173, %181 : vector<24x128xf32>
    %183 = arith.addf %170, %176 : vector<24x128xf32>
    %184 = arith.addf %171, %179 : vector<24x128xf32>
    %185 = arith.addf %172, %182 : vector<24x128xf32>
    %c121_i32 = arith.constant 121 : i32
    %186 = tpu.dynamic_rotate %7 by %c121_i32 dim 1 : vector<24x128xf32>, i32 -> vector<24x128xf32>
    %c14 = arith.constant 14 : index
    %c0_53 = arith.constant 0 : index
    %187 = vector.load %arg2[%c14, %c0_53] : memref<45x128xf32, #tpu.memory_space<vmem>>, vector<1x128xf32>
    %188 = vector.broadcast %187 : vector<1x128xf32> to vector<24x128xf32>
    %189 = arith.mulf %186, %188 : vector<24x128xf32>
    %c29 = arith.constant 29 : index
    %c0_54 = arith.constant 0 : index
    %190 = vector.load %arg2[%c29, %c0_54] : memref<45x128xf32, #tpu.memory_space<vmem>>, vector<1x128xf32>
    %191 = vector.broadcast %190 : vector<1x128xf32> to vector<24x128xf32>
    %192 = arith.mulf %186, %191 : vector<24x128xf32>
    %c44 = arith.constant 44 : index
    %c0_55 = arith.constant 0 : index
    %193 = vector.load %arg2[%c44, %c0_55] : memref<45x128xf32, #tpu.memory_space<vmem>>, vector<1x128xf32>
    %194 = vector.broadcast %193 : vector<1x128xf32> to vector<24x128xf32>
    %195 = arith.mulf %186, %194 : vector<24x128xf32>
    %196 = arith.addf %183, %189 : vector<24x128xf32>
    %197 = arith.addf %184, %192 : vector<24x128xf32>
    %198 = arith.addf %185, %195 : vector<24x128xf32>
    %c1_i32_56 = arith.constant 1 : i32
    %199 = tpu.dynamic_rotate %196 by %c1_i32_56 dim 0 : vector<24x128xf32>, i32 -> vector<24x128xf32>
    %200 = arith.addf %197, %199 : vector<24x128xf32>
    %c23_i32 = arith.constant 23 : i32
    %201 = tpu.dynamic_rotate %198 by %c23_i32 dim 0 : vector<24x128xf32>, i32 -> vector<24x128xf32>
    %202 = arith.addf %200, %201 : vector<24x128xf32>
    %c0_57 = arith.constant 0 : index
    %c0_58 = arith.constant 0 : index
    %203 = vector.load %arg3[%c0_57, %c0_58] : memref<1x128xf32, #tpu.memory_space<vmem>>, vector<1x128xf32>
    %204 = vector.broadcast %203 : vector<1x128xf32> to vector<24x128xf32>
    %205 = arith.addf %202, %204 : vector<24x128xf32>
    %206 = vector.extract_strided_slice %205 {offsets = [0, 0], sizes = [16, 64], strides = [1, 1]} : vector<24x128xf32> to vector<16x64xf32>
    %cst_59 = arith.constant 0.000000e+00 : f32
    %207 = vector.broadcast %cst_59 : f32 to vector<16x64xf32>
    %208 = arith.maximumf %206, %207 : vector<16x64xf32>
    %c0_60 = arith.constant 0 : index
    %c0_61 = arith.constant 0 : index
    %209 = vector.load %arg9[%c0_60, %c0_61] : memref<24x128xf32, #tpu.memory_space<vmem>>, vector<16x64xf32>
    tpu.vector_store %arg9[%c0_60, %c0_61], %208 {strides = array<i32>} : memref<24x128xf32, #tpu.memory_space<vmem>>, vector<16x64xf32>,
    %c0_62 = arith.constant 0 : index
    %c0_63 = arith.constant 0 : index
    %210 = vector.load %arg9[%c0_62, %c0_63] : memref<24x128xf32, #tpu.memory_space<vmem>>, vector<24x128xf32>
    %c7_i32_64 = arith.constant 7 : i32
    %211 = tpu.dynamic_rotate %210 by %c7_i32_64 dim 1 : vector<24x128xf32>, i32 -> vector<24x128xf32>
    %c0_65 = arith.constant 0 : index
    %c0_66 = arith.constant 0 : index
    %212 = vector.load %arg4[%c0_65, %c0_66] : memref<45x128xf32, #tpu.memory_space<vmem>>, vector<1x128xf32>
    %213 = vector.broadcast %212 : vector<1x128xf32> to vector<24x128xf32>
    %214 = arith.mulf %211, %213 : vector<24x128xf32>
    %c15_67 = arith.constant 15 : index
    %c0_68 = arith.constant 0 : index
    %215 = vector.load %arg4[%c15_67, %c0_68] : memref<45x128xf32, #tpu.memory_space<vmem>>, vector<1x128xf32>
    %216 = vector.broadcast %215 : vector<1x128xf32> to vector<24x128xf32>
    %217 = arith.mulf %211, %216 : vector<24x128xf32>
    %c30_69 = arith.constant 30 : index
    %c0_70 = arith.constant 0 : index
    %218 = vector.load %arg4[%c30_69, %c0_70] : memref<45x128xf32, #tpu.memory_space<vmem>>, vector<1x128xf32>
    %219 = vector.broadcast %218 : vector<1x128xf32> to vector<24x128xf32>
    %220 = arith.mulf %211, %219 : vector<24x128xf32>
    %c6_i32_71 = arith.constant 6 : i32
    %221 = tpu.dynamic_rotate %210 by %c6_i32_71 dim 1 : vector<24x128xf32>, i32 -> vector<24x128xf32>
    %c1_72 = arith.constant 1 : index
    %c0_73 = arith.constant 0 : index
    %222 = vector.load %arg4[%c1_72, %c0_73] : memref<45x128xf32, #tpu.memory_space<vmem>>, vector<1x128xf32>
    %223 = vector.broadcast %222 : vector<1x128xf32> to vector<24x128xf32>
    %224 = arith.mulf %221, %223 : vector<24x128xf32>
    %c16_74 = arith.constant 16 : index
    %c0_75 = arith.constant 0 : index
    %225 = vector.load %arg4[%c16_74, %c0_75] : memref<45x128xf32, #tpu.memory_space<vmem>>, vector<1x128xf32>
    %226 = vector.broadcast %225 : vector<1x128xf32> to vector<24x128xf32>
    %227 = arith.mulf %221, %226 : vector<24x128xf32>
    %c31_76 = arith.constant 31 : index
    %c0_77 = arith.constant 0 : index
    %228 = vector.load %arg4[%c31_76, %c0_77] : memref<45x128xf32, #tpu.memory_space<vmem>>, vector<1x128xf32>
    %229 = vector.broadcast %228 : vector<1x128xf32> to vector<24x128xf32>
    %230 = arith.mulf %221, %229 : vector<24x128xf32>
    %231 = arith.addf %214, %224 : vector<24x128xf32>
    %232 = arith.addf %217, %227 : vector<24x128xf32>
    %233 = arith.addf %220, %230 : vector<24x128xf32>
    %c5_i32_78 = arith.constant 5 : i32
    %234 = tpu.dynamic_rotate %210 by %c5_i32_78 dim 1 : vector<24x128xf32>, i32 -> vector<24x128xf32>
    %c2_79 = arith.constant 2 : index
    %c0_80 = arith.constant 0 : index
    %235 = vector.load %arg4[%c2_79, %c0_80] : memref<45x128xf32, #tpu.memory_space<vmem>>, vector<1x128xf32>
    %236 = vector.broadcast %235 : vector<1x128xf32> to vector<24x128xf32>
    %237 = arith.mulf %234, %236 : vector<24x128xf32>
    %c17_81 = arith.constant 17 : index
    %c0_82 = arith.constant 0 : index
    %238 = vector.load %arg4[%c17_81, %c0_82] : memref<45x128xf32, #tpu.memory_space<vmem>>, vector<1x128xf32>
    %239 = vector.broadcast %238 : vector<1x128xf32> to vector<24x128xf32>
    %240 = arith.mulf %234, %239 : vector<24x128xf32>
    %c32_83 = arith.constant 32 : index
    %c0_84 = arith.constant 0 : index
    %241 = vector.load %arg4[%c32_83, %c0_84] : memref<45x128xf32, #tpu.memory_space<vmem>>, vector<1x128xf32>
    %242 = vector.broadcast %241 : vector<1x128xf32> to vector<24x128xf32>
    %243 = arith.mulf %234, %242 : vector<24x128xf32>
    %244 = arith.addf %231, %237 : vector<24x128xf32>
    %245 = arith.addf %232, %240 : vector<24x128xf32>
    %246 = arith.addf %233, %243 : vector<24x128xf32>
    %c4_i32_85 = arith.constant 4 : i32
    %247 = tpu.dynamic_rotate %210 by %c4_i32_85 dim 1 : vector<24x128xf32>, i32 -> vector<24x128xf32>
    %c3_86 = arith.constant 3 : index
    %c0_87 = arith.constant 0 : index
    %248 = vector.load %arg4[%c3_86, %c0_87] : memref<45x128xf32, #tpu.memory_space<vmem>>, vector<1x128xf32>
    %249 = vector.broadcast %248 : vector<1x128xf32> to vector<24x128xf32>
    %250 = arith.mulf %247, %249 : vector<24x128xf32>
    %c18_88 = arith.constant 18 : index
    %c0_89 = arith.constant 0 : index
    %251 = vector.load %arg4[%c18_88, %c0_89] : memref<45x128xf32, #tpu.memory_space<vmem>>, vector<1x128xf32>
    %252 = vector.broadcast %251 : vector<1x128xf32> to vector<24x128xf32>
    %253 = arith.mulf %247, %252 : vector<24x128xf32>
    %c33_90 = arith.constant 33 : index
    %c0_91 = arith.constant 0 : index
    %254 = vector.load %arg4[%c33_90, %c0_91] : memref<45x128xf32, #tpu.memory_space<vmem>>, vector<1x128xf32>
    %255 = vector.broadcast %254 : vector<1x128xf32> to vector<24x128xf32>
    %256 = arith.mulf %247, %255 : vector<24x128xf32>
    %257 = arith.addf %244, %250 : vector<24x128xf32>
    %258 = arith.addf %245, %253 : vector<24x128xf32>
    %259 = arith.addf %246, %256 : vector<24x128xf32>
    %c3_i32_92 = arith.constant 3 : i32
    %260 = tpu.dynamic_rotate %210 by %c3_i32_92 dim 1 : vector<24x128xf32>, i32 -> vector<24x128xf32>
    %c4_93 = arith.constant 4 : index
    %c0_94 = arith.constant 0 : index
    %261 = vector.load %arg4[%c4_93, %c0_94] : memref<45x128xf32, #tpu.memory_space<vmem>>, vector<1x128xf32>
    %262 = vector.broadcast %261 : vector<1x128xf32> to vector<24x128xf32>
    %263 = arith.mulf %260, %262 : vector<24x128xf32>
    %c19_95 = arith.constant 19 : index
    %c0_96 = arith.constant 0 : index
    %264 = vector.load %arg4[%c19_95, %c0_96] : memref<45x128xf32, #tpu.memory_space<vmem>>, vector<1x128xf32>
    %265 = vector.broadcast %264 : vector<1x128xf32> to vector<24x128xf32>
    %266 = arith.mulf %260, %265 : vector<24x128xf32>
    %c34_97 = arith.constant 34 : index
    %c0_98 = arith.constant 0 : index
    %267 = vector.load %arg4[%c34_97, %c0_98] : memref<45x128xf32, #tpu.memory_space<vmem>>, vector<1x128xf32>
    %268 = vector.broadcast %267 : vector<1x128xf32> to vector<24x128xf32>
    %269 = arith.mulf %260, %268 : vector<24x128xf32>
    %270 = arith.addf %257, %263 : vector<24x128xf32>
    %271 = arith.addf %258, %266 : vector<24x128xf32>
    %272 = arith.addf %259, %269 : vector<24x128xf32>
    %c2_i32_99 = arith.constant 2 : i32
    %273 = tpu.dynamic_rotate %210 by %c2_i32_99 dim 1 : vector<24x128xf32>, i32 -> vector<24x128xf32>
    %c5_100 = arith.constant 5 : index
    %c0_101 = arith.constant 0 : index
    %274 = vector.load %arg4[%c5_100, %c0_101] : memref<45x128xf32, #tpu.memory_space<vmem>>, vector<1x128xf32>
    %275 = vector.broadcast %274 : vector<1x128xf32> to vector<24x128xf32>
    %276 = arith.mulf %273, %275 : vector<24x128xf32>
    %c20_102 = arith.constant 20 : index
    %c0_103 = arith.constant 0 : index
    %277 = vector.load %arg4[%c20_102, %c0_103] : memref<45x128xf32, #tpu.memory_space<vmem>>, vector<1x128xf32>
    %278 = vector.broadcast %277 : vector<1x128xf32> to vector<24x128xf32>
    %279 = arith.mulf %273, %278 : vector<24x128xf32>
    %c35_104 = arith.constant 35 : index
    %c0_105 = arith.constant 0 : index
    %280 = vector.load %arg4[%c35_104, %c0_105] : memref<45x128xf32, #tpu.memory_space<vmem>>, vector<1x128xf32>
    %281 = vector.broadcast %280 : vector<1x128xf32> to vector<24x128xf32>
    %282 = arith.mulf %273, %281 : vector<24x128xf32>
    %283 = arith.addf %270, %276 : vector<24x128xf32>
    %284 = arith.addf %271, %279 : vector<24x128xf32>
    %285 = arith.addf %272, %282 : vector<24x128xf32>
    %c1_i32_106 = arith.constant 1 : i32
    %286 = tpu.dynamic_rotate %210 by %c1_i32_106 dim 1 : vector<24x128xf32>, i32 -> vector<24x128xf32>
    %c6_107 = arith.constant 6 : index
    %c0_108 = arith.constant 0 : index
    %287 = vector.load %arg4[%c6_107, %c0_108] : memref<45x128xf32, #tpu.memory_space<vmem>>, vector<1x128xf32>
    %288 = vector.broadcast %287 : vector<1x128xf32> to vector<24x128xf32>
    %289 = arith.mulf %286, %288 : vector<24x128xf32>
    %c21_109 = arith.constant 21 : index
    %c0_110 = arith.constant 0 : index
    %290 = vector.load %arg4[%c21_109, %c0_110] : memref<45x128xf32, #tpu.memory_space<vmem>>, vector<1x128xf32>
    %291 = vector.broadcast %290 : vector<1x128xf32> to vector<24x128xf32>
    %292 = arith.mulf %286, %291 : vector<24x128xf32>
    %c36_111 = arith.constant 36 : index
    %c0_112 = arith.constant 0 : index
    %293 = vector.load %arg4[%c36_111, %c0_112] : memref<45x128xf32, #tpu.memory_space<vmem>>, vector<1x128xf32>
    %294 = vector.broadcast %293 : vector<1x128xf32> to vector<24x128xf32>
    %295 = arith.mulf %286, %294 : vector<24x128xf32>
    %296 = arith.addf %283, %289 : vector<24x128xf32>
    %297 = arith.addf %284, %292 : vector<24x128xf32>
    %298 = arith.addf %285, %295 : vector<24x128xf32>
    %c7_113 = arith.constant 7 : index
    %c0_114 = arith.constant 0 : index
    %299 = vector.load %arg4[%c7_113, %c0_114] : memref<45x128xf32, #tpu.memory_space<vmem>>, vector<1x128xf32>
    %300 = vector.broadcast %299 : vector<1x128xf32> to vector<24x128xf32>
    %301 = arith.mulf %210, %300 : vector<24x128xf32>
    %c22_115 = arith.constant 22 : index
    %c0_116 = arith.constant 0 : index
    %302 = vector.load %arg4[%c22_115, %c0_116] : memref<45x128xf32, #tpu.memory_space<vmem>>, vector<1x128xf32>
    %303 = vector.broadcast %302 : vector<1x128xf32> to vector<24x128xf32>
    %304 = arith.mulf %210, %303 : vector<24x128xf32>
    %c37_117 = arith.constant 37 : index
    %c0_118 = arith.constant 0 : index
    %305 = vector.load %arg4[%c37_117, %c0_118] : memref<45x128xf32, #tpu.memory_space<vmem>>, vector<1x128xf32>
    %306 = vector.broadcast %305 : vector<1x128xf32> to vector<24x128xf32>
    %307 = arith.mulf %210, %306 : vector<24x128xf32>
    %308 = arith.addf %296, %301 : vector<24x128xf32>
    %309 = arith.addf %297, %304 : vector<24x128xf32>
    %310 = arith.addf %298, %307 : vector<24x128xf32>
    %c127_i32_119 = arith.constant 127 : i32
    %311 = tpu.dynamic_rotate %210 by %c127_i32_119 dim 1 : vector<24x128xf32>, i32 -> vector<24x128xf32>
    %c8_120 = arith.constant 8 : index
    %c0_121 = arith.constant 0 : index
    %312 = vector.load %arg4[%c8_120, %c0_121] : memref<45x128xf32, #tpu.memory_space<vmem>>, vector<1x128xf32>
    %313 = vector.broadcast %312 : vector<1x128xf32> to vector<24x128xf32>
    %314 = arith.mulf %311, %313 : vector<24x128xf32>
    %c23_122 = arith.constant 23 : index
    %c0_123 = arith.constant 0 : index
    %315 = vector.load %arg4[%c23_122, %c0_123] : memref<45x128xf32, #tpu.memory_space<vmem>>, vector<1x128xf32>
    %316 = vector.broadcast %315 : vector<1x128xf32> to vector<24x128xf32>
    %317 = arith.mulf %311, %316 : vector<24x128xf32>
    %c38_124 = arith.constant 38 : index
    %c0_125 = arith.constant 0 : index
    %318 = vector.load %arg4[%c38_124, %c0_125] : memref<45x128xf32, #tpu.memory_space<vmem>>, vector<1x128xf32>
    %319 = vector.broadcast %318 : vector<1x128xf32> to vector<24x128xf32>
    %320 = arith.mulf %311, %319 : vector<24x128xf32>
    %321 = arith.addf %308, %314 : vector<24x128xf32>
    %322 = arith.addf %309, %317 : vector<24x128xf32>
    %323 = arith.addf %310, %320 : vector<24x128xf32>
    %c126_i32_126 = arith.constant 126 : i32
    %324 = tpu.dynamic_rotate %210 by %c126_i32_126 dim 1 : vector<24x128xf32>, i32 -> vector<24x128xf32>
    %c9_127 = arith.constant 9 : index
    %c0_128 = arith.constant 0 : index
    %325 = vector.load %arg4[%c9_127, %c0_128] : memref<45x128xf32, #tpu.memory_space<vmem>>, vector<1x128xf32>
    %326 = vector.broadcast %325 : vector<1x128xf32> to vector<24x128xf32>
    %327 = arith.mulf %324, %326 : vector<24x128xf32>
    %c24_129 = arith.constant 24 : index
    %c0_130 = arith.constant 0 : index
    %328 = vector.load %arg4[%c24_129, %c0_130] : memref<45x128xf32, #tpu.memory_space<vmem>>, vector<1x128xf32>
    %329 = vector.broadcast %328 : vector<1x128xf32> to vector<24x128xf32>
    %330 = arith.mulf %324, %329 : vector<24x128xf32>
    %c39_131 = arith.constant 39 : index
    %c0_132 = arith.constant 0 : index
    %331 = vector.load %arg4[%c39_131, %c0_132] : memref<45x128xf32, #tpu.memory_space<vmem>>, vector<1x128xf32>
    %332 = vector.broadcast %331 : vector<1x128xf32> to vector<24x128xf32>
    %333 = arith.mulf %324, %332 : vector<24x128xf32>
    %334 = arith.addf %321, %327 : vector<24x128xf32>
    %335 = arith.addf %322, %330 : vector<24x128xf32>
    %336 = arith.addf %323, %333 : vector<24x128xf32>
    %c125_i32_133 = arith.constant 125 : i32
    %337 = tpu.dynamic_rotate %210 by %c125_i32_133 dim 1 : vector<24x128xf32>, i32 -> vector<24x128xf32>
    %c10_134 = arith.constant 10 : index
    %c0_135 = arith.constant 0 : index
    %338 = vector.load %arg4[%c10_134, %c0_135] : memref<45x128xf32, #tpu.memory_space<vmem>>, vector<1x128xf32>
    %339 = vector.broadcast %338 : vector<1x128xf32> to vector<24x128xf32>
    %340 = arith.mulf %337, %339 : vector<24x128xf32>
    %c25_136 = arith.constant 25 : index
    %c0_137 = arith.constant 0 : index
    %341 = vector.load %arg4[%c25_136, %c0_137] : memref<45x128xf32, #tpu.memory_space<vmem>>, vector<1x128xf32>
    %342 = vector.broadcast %341 : vector<1x128xf32> to vector<24x128xf32>
    %343 = arith.mulf %337, %342 : vector<24x128xf32>
    %c40_138 = arith.constant 40 : index
    %c0_139 = arith.constant 0 : index
    %344 = vector.load %arg4[%c40_138, %c0_139] : memref<45x128xf32, #tpu.memory_space<vmem>>, vector<1x128xf32>
    %345 = vector.broadcast %344 : vector<1x128xf32> to vector<24x128xf32>
    %346 = arith.mulf %337, %345 : vector<24x128xf32>
    %347 = arith.addf %334, %340 : vector<24x128xf32>
    %348 = arith.addf %335, %343 : vector<24x128xf32>
    %349 = arith.addf %336, %346 : vector<24x128xf32>
    %c124_i32_140 = arith.constant 124 : i32
    %350 = tpu.dynamic_rotate %210 by %c124_i32_140 dim 1 : vector<24x128xf32>, i32 -> vector<24x128xf32>
    %c11_141 = arith.constant 11 : index
    %c0_142 = arith.constant 0 : index
    %351 = vector.load %arg4[%c11_141, %c0_142] : memref<45x128xf32, #tpu.memory_space<vmem>>, vector<1x128xf32>
    %352 = vector.broadcast %351 : vector<1x128xf32> to vector<24x128xf32>
    %353 = arith.mulf %350, %352 : vector<24x128xf32>
    %c26_143 = arith.constant 26 : index
    %c0_144 = arith.constant 0 : index
    %354 = vector.load %arg4[%c26_143, %c0_144] : memref<45x128xf32, #tpu.memory_space<vmem>>, vector<1x128xf32>
    %355 = vector.broadcast %354 : vector<1x128xf32> to vector<24x128xf32>
    %356 = arith.mulf %350, %355 : vector<24x128xf32>
    %c41_145 = arith.constant 41 : index
    %c0_146 = arith.constant 0 : index
    %357 = vector.load %arg4[%c41_145, %c0_146] : memref<45x128xf32, #tpu.memory_space<vmem>>, vector<1x128xf32>
    %358 = vector.broadcast %357 : vector<1x128xf32> to vector<24x128xf32>
    %359 = arith.mulf %350, %358 : vector<24x128xf32>
    %360 = arith.addf %347, %353 : vector<24x128xf32>
    %361 = arith.addf %348, %356 : vector<24x128xf32>
    %362 = arith.addf %349, %359 : vector<24x128xf32>
    %c123_i32_147 = arith.constant 123 : i32
    %363 = tpu.dynamic_rotate %210 by %c123_i32_147 dim 1 : vector<24x128xf32>, i32 -> vector<24x128xf32>
    %c12_148 = arith.constant 12 : index
    %c0_149 = arith.constant 0 : index
    %364 = vector.load %arg4[%c12_148, %c0_149] : memref<45x128xf32, #tpu.memory_space<vmem>>, vector<1x128xf32>
    %365 = vector.broadcast %364 : vector<1x128xf32> to vector<24x128xf32>
    %366 = arith.mulf %363, %365 : vector<24x128xf32>
    %c27_150 = arith.constant 27 : index
    %c0_151 = arith.constant 0 : index
    %367 = vector.load %arg4[%c27_150, %c0_151] : memref<45x128xf32, #tpu.memory_space<vmem>>, vector<1x128xf32>
    %368 = vector.broadcast %367 : vector<1x128xf32> to vector<24x128xf32>
    %369 = arith.mulf %363, %368 : vector<24x128xf32>
    %c42_152 = arith.constant 42 : index
    %c0_153 = arith.constant 0 : index
    %370 = vector.load %arg4[%c42_152, %c0_153] : memref<45x128xf32, #tpu.memory_space<vmem>>, vector<1x128xf32>
    %371 = vector.broadcast %370 : vector<1x128xf32> to vector<24x128xf32>
    %372 = arith.mulf %363, %371 : vector<24x128xf32>
    %373 = arith.addf %360, %366 : vector<24x128xf32>
    %374 = arith.addf %361, %369 : vector<24x128xf32>
    %375 = arith.addf %362, %372 : vector<24x128xf32>
    %c122_i32_154 = arith.constant 122 : i32
    %376 = tpu.dynamic_rotate %210 by %c122_i32_154 dim 1 : vector<24x128xf32>, i32 -> vector<24x128xf32>
    %c13_155 = arith.constant 13 : index
    %c0_156 = arith.constant 0 : index
    %377 = vector.load %arg4[%c13_155, %c0_156] : memref<45x128xf32, #tpu.memory_space<vmem>>, vector<1x128xf32>
    %378 = vector.broadcast %377 : vector<1x128xf32> to vector<24x128xf32>
    %379 = arith.mulf %376, %378 : vector<24x128xf32>
    %c28_157 = arith.constant 28 : index
    %c0_158 = arith.constant 0 : index
    %380 = vector.load %arg4[%c28_157, %c0_158] : memref<45x128xf32, #tpu.memory_space<vmem>>, vector<1x128xf32>
    %381 = vector.broadcast %380 : vector<1x128xf32> to vector<24x128xf32>
    %382 = arith.mulf %376, %381 : vector<24x128xf32>
    %c43_159 = arith.constant 43 : index
    %c0_160 = arith.constant 0 : index
    %383 = vector.load %arg4[%c43_159, %c0_160] : memref<45x128xf32, #tpu.memory_space<vmem>>, vector<1x128xf32>
    %384 = vector.broadcast %383 : vector<1x128xf32> to vector<24x128xf32>
    %385 = arith.mulf %376, %384 : vector<24x128xf32>
    %386 = arith.addf %373, %379 : vector<24x128xf32>
    %387 = arith.addf %374, %382 : vector<24x128xf32>
    %388 = arith.addf %375, %385 : vector<24x128xf32>
    %c121_i32_161 = arith.constant 121 : i32
    %389 = tpu.dynamic_rotate %210 by %c121_i32_161 dim 1 : vector<24x128xf32>, i32 -> vector<24x128xf32>
    %c14_162 = arith.constant 14 : index
    %c0_163 = arith.constant 0 : index
    %390 = vector.load %arg4[%c14_162, %c0_163] : memref<45x128xf32, #tpu.memory_space<vmem>>, vector<1x128xf32>
    %391 = vector.broadcast %390 : vector<1x128xf32> to vector<24x128xf32>
    %392 = arith.mulf %389, %391 : vector<24x128xf32>
    %c29_164 = arith.constant 29 : index
    %c0_165 = arith.constant 0 : index
    %393 = vector.load %arg4[%c29_164, %c0_165] : memref<45x128xf32, #tpu.memory_space<vmem>>, vector<1x128xf32>
    %394 = vector.broadcast %393 : vector<1x128xf32> to vector<24x128xf32>
    %395 = arith.mulf %389, %394 : vector<24x128xf32>
    %c44_166 = arith.constant 44 : index
    %c0_167 = arith.constant 0 : index
    %396 = vector.load %arg4[%c44_166, %c0_167] : memref<45x128xf32, #tpu.memory_space<vmem>>, vector<1x128xf32>
    %397 = vector.broadcast %396 : vector<1x128xf32> to vector<24x128xf32>
    %398 = arith.mulf %389, %397 : vector<24x128xf32>
    %399 = arith.addf %386, %392 : vector<24x128xf32>
    %400 = arith.addf %387, %395 : vector<24x128xf32>
    %401 = arith.addf %388, %398 : vector<24x128xf32>
    %c1_i32_168 = arith.constant 1 : i32
    %402 = tpu.dynamic_rotate %399 by %c1_i32_168 dim 0 : vector<24x128xf32>, i32 -> vector<24x128xf32>
    %403 = arith.addf %400, %402 : vector<24x128xf32>
    %c23_i32_169 = arith.constant 23 : i32
    %404 = tpu.dynamic_rotate %401 by %c23_i32_169 dim 0 : vector<24x128xf32>, i32 -> vector<24x128xf32>
    %405 = arith.addf %403, %404 : vector<24x128xf32>
    %c0_170 = arith.constant 0 : index
    %c0_171 = arith.constant 0 : index
    %406 = vector.load %arg5[%c0_170, %c0_171] : memref<1x128xf32, #tpu.memory_space<vmem>>, vector<1x128xf32>
    %407 = vector.broadcast %406 : vector<1x128xf32> to vector<24x128xf32>
    %408 = arith.addf %405, %407 : vector<24x128xf32>
    %409 = vector.extract_strided_slice %408 {offsets = [0, 0], sizes = [16, 64], strides = [1, 1]} : vector<24x128xf32> to vector<16x64xf32>
    %cst_172 = arith.constant 0.000000e+00 : f32
    %410 = vector.broadcast %cst_172 : f32 to vector<16x64xf32>
    %411 = arith.maximumf %409, %410 : vector<16x64xf32>
    %c0_173 = arith.constant 0 : index
    %c0_174 = arith.constant 0 : index
    %412 = vector.load %arg9[%c0_173, %c0_174] : memref<24x128xf32, #tpu.memory_space<vmem>>, vector<16x64xf32>
    tpu.vector_store %arg9[%c0_173, %c0_174], %411 {strides = array<i32>} : memref<24x128xf32, #tpu.memory_space<vmem>>, vector<16x64xf32>,
    %c0_175 = arith.constant 0 : index
    %c0_176 = arith.constant 0 : index
    %413 = vector.load %arg9[%c0_175, %c0_176] : memref<24x128xf32, #tpu.memory_space<vmem>>, vector<24x128xf32>
    %c3_i32_177 = arith.constant 3 : i32
    %414 = tpu.dynamic_rotate %413 by %c3_i32_177 dim 1 : vector<24x128xf32>, i32 -> vector<24x128xf32>
    %c0_178 = arith.constant 0 : index
    %c0_179 = arith.constant 0 : index
    %415 = vector.load %arg6[%c0_178, %c0_179] : memref<7x128xf32, #tpu.memory_space<vmem>>, vector<1x128xf32>
    %416 = vector.broadcast %415 : vector<1x128xf32> to vector<24x128xf32>
    %417 = arith.mulf %414, %416 : vector<24x128xf32>
    %c2_i32_180 = arith.constant 2 : i32
    %418 = tpu.dynamic_rotate %413 by %c2_i32_180 dim 1 : vector<24x128xf32>, i32 -> vector<24x128xf32>
    %c1_181 = arith.constant 1 : index
    %c0_182 = arith.constant 0 : index
    %419 = vector.load %arg6[%c1_181, %c0_182] : memref<7x128xf32, #tpu.memory_space<vmem>>, vector<1x128xf32>
    %420 = vector.broadcast %419 : vector<1x128xf32> to vector<24x128xf32>
    %421 = arith.mulf %418, %420 : vector<24x128xf32>
    %422 = arith.addf %417, %421 : vector<24x128xf32>
    %c1_i32_183 = arith.constant 1 : i32
    %423 = tpu.dynamic_rotate %413 by %c1_i32_183 dim 1 : vector<24x128xf32>, i32 -> vector<24x128xf32>
    %c2_184 = arith.constant 2 : index
    %c0_185 = arith.constant 0 : index
    %424 = vector.load %arg6[%c2_184, %c0_185] : memref<7x128xf32, #tpu.memory_space<vmem>>, vector<1x128xf32>
    %425 = vector.broadcast %424 : vector<1x128xf32> to vector<24x128xf32>
    %426 = arith.mulf %423, %425 : vector<24x128xf32>
    %427 = arith.addf %422, %426 : vector<24x128xf32>
    %c3_186 = arith.constant 3 : index
    %c0_187 = arith.constant 0 : index
    %428 = vector.load %arg6[%c3_186, %c0_187] : memref<7x128xf32, #tpu.memory_space<vmem>>, vector<1x128xf32>
    %429 = vector.broadcast %428 : vector<1x128xf32> to vector<24x128xf32>
    %430 = arith.mulf %413, %429 : vector<24x128xf32>
    %431 = arith.addf %427, %430 : vector<24x128xf32>
    %c127_i32_188 = arith.constant 127 : i32
    %432 = tpu.dynamic_rotate %413 by %c127_i32_188 dim 1 : vector<24x128xf32>, i32 -> vector<24x128xf32>
    %c4_189 = arith.constant 4 : index
    %c0_190 = arith.constant 0 : index
    %433 = vector.load %arg6[%c4_189, %c0_190] : memref<7x128xf32, #tpu.memory_space<vmem>>, vector<1x128xf32>
    %434 = vector.broadcast %433 : vector<1x128xf32> to vector<24x128xf32>
    %435 = arith.mulf %432, %434 : vector<24x128xf32>
    %436 = arith.addf %431, %435 : vector<24x128xf32>
    %c126_i32_191 = arith.constant 126 : i32
    %437 = tpu.dynamic_rotate %413 by %c126_i32_191 dim 1 : vector<24x128xf32>, i32 -> vector<24x128xf32>
    %c5_192 = arith.constant 5 : index
    %c0_193 = arith.constant 0 : index
    %438 = vector.load %arg6[%c5_192, %c0_193] : memref<7x128xf32, #tpu.memory_space<vmem>>, vector<1x128xf32>
    %439 = vector.broadcast %438 : vector<1x128xf32> to vector<24x128xf32>
    %440 = arith.mulf %437, %439 : vector<24x128xf32>
    %441 = arith.addf %436, %440 : vector<24x128xf32>
    %c125_i32_194 = arith.constant 125 : i32
    %442 = tpu.dynamic_rotate %413 by %c125_i32_194 dim 1 : vector<24x128xf32>, i32 -> vector<24x128xf32>
    %c6_195 = arith.constant 6 : index
    %c0_196 = arith.constant 0 : index
    %443 = vector.load %arg6[%c6_195, %c0_196] : memref<7x128xf32, #tpu.memory_space<vmem>>, vector<1x128xf32>
    %444 = vector.broadcast %443 : vector<1x128xf32> to vector<24x128xf32>
    %445 = arith.mulf %442, %444 : vector<24x128xf32>
    %446 = arith.addf %441, %445 : vector<24x128xf32>
    %c0_197 = arith.constant 0 : index
    %c0_198 = arith.constant 0 : index
    %447 = vector.load %arg7[%c0_197, %c0_198] : memref<1x128xf32, #tpu.memory_space<vmem>>, vector<1x128xf32>
    %448 = vector.broadcast %447 : vector<1x128xf32> to vector<24x128xf32>
    %449 = arith.addf %446, %448 : vector<24x128xf32>
    %450 = vector.extract_strided_slice %449 {offsets = [0, 0], sizes = [16, 64], strides = [1, 1]} : vector<24x128xf32> to vector<16x64xf32>
    %451 = arith.addf %450, %5 : vector<16x64xf32>
    %c0_199 = arith.constant 0 : index
    %c0_200 = arith.constant 0 : index
    %c0_201 = arith.constant 0 : index
    %452 = vector.load %arg8[%c0_199, %c0_200, %c0_201] : memref<1x16x64xf32, #tpu.memory_space<vmem>>, vector<1x16x64xf32>
    %453 = vector.shape_cast %452 : vector<1x16x64xf32> to vector<16x64xf32>
    %454 = vector.shape_cast %451 : vector<16x64xf32> to vector<1x16x64xf32>
    tpu.vector_store %arg8[%c0_199, %c0_200, %c0_201], %454 {strides = array<i32>} : memref<1x16x64xf32, #tpu.memory_space<vmem>>, vector<1x16x64xf32>,
    return
  }
  func.func @transform_0(%arg0: i32) -> (i32, i32, i32) {
    %c0_i32 = arith.constant 0 : i32
    %c0_i32_0 = arith.constant 0 : i32
    %c0_i32_1 = arith.constant 0 : i32
    return %arg0, %c0_i32, %c0_i32_0 : i32, i32, i32
  }
  func.func @transform_1(%arg0: i32) -> (i32, i32) {
    %c0_i32 = arith.constant 0 : i32
    %c0_i32_0 = arith.constant 0 : i32
    %c0_i32_1 = arith.constant 0 : i32
    return %c0_i32, %c0_i32_0 : i32, i32
  }
  func.func @transform_2(%arg0: i32) -> (i32, i32) {
    %c0_i32 = arith.constant 0 : i32
    %c0_i32_0 = arith.constant 0 : i32
    %c0_i32_1 = arith.constant 0 : i32
    return %c0_i32, %c0_i32_0 : i32, i32
  }
  func.func @transform_3(%arg0: i32) -> (i32, i32) {
    %c0_i32 = arith.constant 0 : i32
    %c0_i32_0 = arith.constant 0 : i32
    %c0_i32_1 = arith.constant 0 : i32
    return %c0_i32, %c0_i32_0 : i32, i32
  }
  func.func @transform_4(%arg0: i32) -> (i32, i32) {
    %c0_i32 = arith.constant 0 : i32
    %c0_i32_0 = arith.constant 0 : i32
    %c0_i32_1 = arith.constant 0 : i32
    return %c0_i32, %c0_i32_0 : i32, i32
  }
  func.func @transform_5(%arg0: i32) -> (i32, i32) {
    %c0_i32 = arith.constant 0 : i32
    %c0_i32_0 = arith.constant 0 : i32
    %c0_i32_1 = arith.constant 0 : i32
    return %c0_i32, %c0_i32_0 : i32, i32
  }
  func.func @transform_6(%arg0: i32) -> (i32, i32) {
    %c0_i32 = arith.constant 0 : i32
    %c0_i32_0 = arith.constant 0 : i32
    %c0_i32_1 = arith.constant 0 : i32
    return %c0_i32, %c0_i32_0 : i32, i32
  }
  func.func @transform_7(%arg0: i32) -> (i32, i32, i32) {
    %c0_i32 = arith.constant 0 : i32
    %c0_i32_0 = arith.constant 0 : i32
    %c0_i32_1 = arith.constant 0 : i32
    return %arg0, %c0_i32, %c0_i32_0 : i32, i32, i32
  }
}

</mosaic_0001>

<bundles_post_ra>
// kernel: tpu_custom_call.1
= control target key start
LH: loop header
LB: loop body
LE: loop exit
PB: predicated region body
PF: predicated region fallthrough
CT: control target
= control target key end

     0   :  { %12 = vsyncpa [#allocation4], 0  ;;  %s2884_s0 = inlined_call_operand.hbm [shape: f32[2,16,64], index: 0, kind: input, shape index: {}]   ;;  %s2885_s1 = inlined_call_operand.hbm [shape: f32[45,128], index: 1, kind: input, shape index: {}]   ;;  %s2886_s2 = inlined_call_operand.vmem [shape: f32[1,128], index: 2, kind: input, shape index: {}]   ;;  %s2887_s3 = inlined_call_operand.hbm [shape: f32[45,128], index: 3, kind: input, shape index: {}]   ;;  %s2888_s4 = inlined_call_operand.vmem [shape: f32[1,128], index: 4, kind: input, shape index: {}]   ;;  %s2889_s5 = inlined_call_operand.vmem [shape: f32[7,128], index: 5, kind: input, shape index: {}]   ;;  %s2890_s6 = inlined_call_operand.vmem [shape: f32[1,128], index: 6, kind: input, shape index: {}]   ;;  %s2891_s7 = inlined_call_operand.hbm [shape: f32[2,16,64], index: 7, kind: output, shape index: {}]  }
   0x1   :  { %14 = vsyncpa [#allocation4 + $0x1], 0 }
   0x2   :  { %15 = vsyncpa [#allocation7], 0 }
   0x3   :  { %16 = vsyncpa [#allocation5], 0 }
   0x4   :  { %18 = vsyncpa [#allocation5 + $0x1], 0  ;;  %s2115_s24 = smov 0   ;;  %s2117_s25 = smov 0  }
   0x5   :  { %s2119_s26 = smov 0   ;;  %s2121_s27 = smov 0  }
   0x6 LB: > { %s2136_s28 = sadd.s32 4294967295, %s2050_s27   ;;  %s1687_s29 = sadd.s32 4294967294, %s2050_s27   ;;  %s2050_s27 = sphi %s2121_s27, %s2956_s27   ;;  %s2046_s26 = sphi %s2119_s26, %s2955_s26   ;;  %s2042_s25 = sphi %s2117_s25, %s2954_s25   ;;  %s2038_s24 = sphi %s2115_s24, %s2953_s24  }
   0x7   : > { %p44_p0 = scmp.ne.s32.totalorder %s2042_s25, %s2038_s24  ;;  %p2892_p1 = scmp.eq.s32.totalorder %s2136_s28, 0 }
   0x8   : > { %p200_p3 = scmp.eq.s32.totalorder %s1687_s29, 1  ;;  %p1688_p5 = scmp.ge.s32.totalorder %s2050_s27, 1 }
   0x9   : > { %p2145_p4 = por %p2892_p1, %p44_p0  ;;  %p207_p7 = scmp.lt.s32.totalorder %s2050_s27, 3 }
   0xa   : > { %p2150_p6 = por %p200_p3, %p44_p0  ;;  %s2052_s10 = smov [#allocation6]  }
   0xb   : > { %s2916_s30 = scalar_select %p2145_p4, 1, 0 }
   0xc   : > { %s2917_s8 = scalar_select %p2150_p6, 1, 0 }
   0xd   : > { %p2155_p8 = pnand %p1688_p5, %p207_p7  ;;  %s219_s11 = sshll.u32 %s2052_s10, 4  ;;  %s2159_s11 = int_to_ptr.vmem [resolvable:$true] %s219_s11 }
   0xe   : > { %s2053_s13 = smov [#allocation8]   ;;  %s1894_s17 = scalar_lea.hbm %s2885_s1, 768 }
   0xf   : > { %p1819_p9 = pneg %p2155_p8  ;;  %s235_s14 = sshll.u32 %s2053_s13, 4  ;;  %s2170_s14 = int_to_ptr.vmem [resolvable:$true] %s235_s14 }
  0x10   : > { %p1895_p12 = scmp.ne.s32.totalorder %s2885_s1, %s1894_s17  ;;  %p1901_p5 = scmp.lt.u32.totalorder %s1894_s17, %s2885_s1 }
  0x11   : > { %p2166_p11 = pnand %p1819_p9, %p2892_p1 }
  0x13   : > { %p1896_p13 = pneg %p2166_p11 }
  0x15   : > { %p1897_p0 = pnand %p1896_p13, %p1895_p12 }
  0x17   : > { %p1898_p3 = pneg %p1897_p0 }
  0x19   : > { %p1903_p7 = pnand %p1901_p5, %p1898_p3 }
  0x1b   : > { %1906 = shalt.err (!%p1903_p7)
}
  0x1c   : > { %s1907_s22 = scalar_lea.vmem %s2159_s11, 768  ;;  %p1915_p2 = scmp.lt.s32.totalorder %s2159_s11, %s2159_s11 }
  0x1d   : > { %p1908_p9 = scmp.ne.s32.totalorder %s2159_s11, %s1907_s22  ;;  %p1916_p12 = scmp.lt.s32.totalorder %s1907_s22, %s1907_s22 }
  0x1f   : > { %p1910_p10 = pnand %p1908_p9, %p1896_p13  ;;  %p1917_p0 = por %p1916_p12, %p1915_p2 }
  0x21   : > { %p1911_p1 = pneg %p1910_p10 }
  0x23   : > { %p1918_p6 = pnand %p1917_p0, %p1911_p1 }
  0x25   : > { %1921 = shalt.err (!%p1918_p6)
}
  0x26   : > { %s2893_s23 = smov 128   ;;  %s2055_s29 = smov 8  }
  0x27   : > { %1822 = dma.hbm_to_vmem [thread:$0]  (!%p2166_p11), %s2885_s1, 768, %s2159_s11, [#allocation7], %s2893_s23, %s2893_s23, %s2055_s29  }
  0x28   : > { %s1922_s17 = scalar_lea.hbm %s2887_s3, 768 }
  0x29   : > { %p1923_p1 = scmp.ne.s32.totalorder %s2887_s3, %s1922_s17  ;;  %p1929_p10 = scmp.lt.u32.totalorder %s1922_s17, %s2887_s3 }
  0x2b   : > { %p1925_p2 = pnand %p1923_p1, %p1896_p13 }
  0x2d   : > { %p1926_p6 = pneg %p1925_p2 }
  0x2f   : > { %p1931_p3 = pnand %p1929_p10, %p1926_p6 }
  0x31   : > { %1934 = shalt.err (!%p1931_p3)
}
  0x32   : > { %s1935_s11 = scalar_lea.vmem %s2170_s14, 768  ;;  %p1943_p12 = scmp.lt.s32.totalorder %s2170_s14, %s2170_s14 }
  0x33   : > { %p1936_p5 = scmp.ne.s32.totalorder %s2170_s14, %s1935_s11  ;;  %p1944_p0 = scmp.lt.s32.totalorder %s1935_s11, %s1935_s11 }
  0x35   : > { %p1938_p7 = pnand %p1936_p5, %p1896_p13  ;;  %p1945_p1 = por %p1944_p0, %p1943_p12 }
  0x37   : > { %p1939_p9 = pneg %p1938_p7 }
  0x39   : > { %p1946_p2 = pnand %p1945_p1, %p1939_p9 }
  0x3b   : > { %1949 = shalt.err (!%p1946_p2)
}
  0x3c   : > { %1825 = dma.hbm_to_vmem [thread:$0]  (!%p2166_p11), %s2887_s3, 768, %s2170_s14, [#allocation7], %s2893_s23, %s2893_s23, %s2055_s29  }
  0x3d   : > { %s2231_s12 = sadd.s32 1, %s2050_s27   ;;  %s31_s13 = sadd.s32 1, %s2046_s26 }
  0x3e   : > { %s28_s15 = ssub.s32 %s2050_s27, %s2231_s12  ;;  %p38_p13 = scmp.ne.s32.totalorder %s2046_s26, %s2042_s25 }
  0x3f   : > { %p29_p6 = scmp.eq.s32.totalorder %s28_s15, 0  ;;  %p39_p10 = scmp.eq.s32.totalorder %s2050_s27, 0 }
  0x40   : > { %p2920_p3 = scmp.eq.s32.totalorder %s2136_s28, 1  ;;  %p1836_p7 = scmp.lt.s32.totalorder %s2050_s27, 2 }
  0x41   : > { %s2247_s17 = scalar_select %p29_p6, %s2046_s26, %s31_s13  }
  0x42   : > { %p2241_p5 = por %p2920_p3, %p38_p13  ;;  %p40_p9 = por %p39_p10, %p38_p13 }
  0x43   : > { %s258_s18 = sand.u32 1, %s2046_s26   ;;  %s1805_s14 = sshll.u32 %s2050_s27, 8 }
  0x44   : > { %s2921_s16 = scalar_select %p2241_p5, 1, 0 }
  0x45   : > { %s1692_s19 = sshll.u32 %s258_s18, 4  ;;  %s2254_s11 = scalar_lea.hbm %s2884_s0, %s1805_s14 }
  0x46   : > { %s262_s22 = scalar_lea.vmem [#allocation3], %s1692_s19  ;;  %p2258_p11 = pnand %p1836_p7, %p40_p9 }
  0x47   : > { %s269_s10 = sshll.u32 %s262_s22, 4  ;;  %s2262_s15 = scalar_lea.sflag [#allocation4], %s258_s18  ;;  %s2256_s10 = int_to_ptr.vmem [resolvable:$true] %s269_s10 }
  0x48   : > { %s1950_s23 = scalar_lea.hbm %s2254_s11, 256  ;;  %p1952_p0 = pneg %p2258_p11 }
  0x49   : > { %p1951_p12 = scmp.ne.s32.totalorder %s2254_s11, %s1950_s23  ;;  %s1955_s20 = scalar_lea.hbm %s2884_s0, 512 }
  0x4a   : > { %p1956_p13 = scmp.lt.u32.totalorder %s2254_s11, %s2884_s0  ;;  %p1957_p6 = scmp.lt.u32.totalorder %s1955_s20, %s1950_s23 }
  0x4b   : > { %p1953_p1 = pnand %p1952_p0, %p1951_p12  ;;  %p1959_p3 = scmp.lt.u32.totalorder %s1950_s23, %s2254_s11 }
  0x4c   : > { %p1958_p10 = por %p1957_p6, %p1956_p13 }
  0x4d   : > { %p1954_p2 = pneg %p1953_p1 }
  0x4e   : > { %p1960_p7 = por %p1959_p3, %p1958_p10 }
  0x50   : > { %p1961_p9 = pnand %p1960_p7, %p1954_p2 }
  0x52   : > { %1964 = shalt.err (!%p1961_p9)
}
  0x53   : > { %s1965_s18 = scalar_lea.vmem %s2256_s10, 256  ;;  %s2056_s19 = smov [#allocation3]  }
  0x54   : > { %p1966_p12 = scmp.ne.s32.totalorder %s2256_s10, %s1965_s18  ;;  %s1970_s14 = sshll.u32 %s2056_s19, 4  ;;  %s1971_s14 = int_to_ptr.vmem [resolvable:$false] %s1970_s14 }
  0x55   : > { %s1972_s21 = scalar_lea.vmem %s1971_s14, 512  ;;  %p1973_p4 = scmp.lt.s32.totalorder %s2256_s10, %s1971_s14 }
  0x56   : > { %p1968_p1 = pnand %p1966_p12, %p1952_p0  ;;  %p1974_p13 = scmp.lt.s32.totalorder %s1972_s21, %s1965_s18 }
  0x58   : > { %p1969_p5 = pneg %p1968_p1  ;;  %p1975_p6 = por %p1974_p13, %p1973_p4 }
  0x5a   : > { %p1976_p10 = pnand %p1975_p6, %p1969_p5 }
  0x5c   : > { %1979 = shalt.err (!%p1976_p10)
}
  0x5d   : > { %s2923_s23 = smov 128   ;;  %281 = sbr.rel (%p2155_p8) target bundleno = 685 (0x2ad), region = 48 }
  0x5e   : > { %1829 = dma.hbm_to_vmem [thread:$0]  (!%p2258_p11), %s2254_s11, 256, %s2256_s10, %s2262_s15, %s2923_s23, %s2923_s23, %s2055_s29  }
  0x64   : > { %s2296_s20 = sand.u32 1, %s2042_s25   ;;  %p2924_p4 = scmp.ne.s32.totalorder %s2916_s30, 0 }
  0x65   : > { %s2896_s22 = sshll.u32 %s2296_s20, 4  ;;  %s284_s18 = scalar_lea.sflag [#allocation4], %s2296_s20 }
  0x66   : > { %s287_s13 = scalar_lea.vmem [#allocation3], %s2896_s22 }
  0x67   : > { %2025 = dma.done.wait (%p2924_p4), %s284_s18, 256  }
  0x68   : > { %2027 = vsyncadd (%p2924_p4), %s284_s18, 4294967040  ;;  %p2925_p5 = scmp.eq.s32.totalorder %s2136_s28, 0 }
  0x6a   : > { %2029 = dma.done.wait (%p2925_p5), [#allocation7], 1536   ;;  %p2926_p8 = pmov %p2925_p5 }
  0x6b   : > { %vm327_vm0 = vcmask 1048064   ;;  %v2057_v0 = vmov 0.0   ;;  %s2058_s9 = smov 7   ;;  %s2059_s30 = smov 5   ;;  %vm332_vm1 = vcmask 523264   ;;  %v2319_v1 = vld [vmem:[%s287_s13] sm:$0xff] }
  0x6c   : > { %2031 = vsyncadd (%p2926_p8), [#allocation7], 4294965760  ;;  %326 = vst [vmem:[#allocation2 + $0x10] sm:$0xff] %v2057_v0  ;;  %342 = vrot.lane.b32.xlu1 %v2057_v0, %s2058_s9  ;;  %408 = vrot.lane.b32.xlu0 %v2057_v0, %s2059_s30  ;;  %s2060_s29 = smov 6   ;;  %v2321_v2 = vld [vmem:[%s287_s13 + $0x8] sm:$0xff]  ;;  %s2061_s11 = smov 4  }
  0x6d   : > { %328 = vst.msk [vmem:[#allocation2] sm:$0xff] %vm327_vm0, %v2057_v0  ;;  %329 = vst.msk [vmem:[#allocation2 + $0x8] sm:$0xff] %vm327_vm0, %v2057_v0  ;;  %s2062_s10 = smov 3   ;;  %s2063_s15 = smov 2   ;;  %v1700_v16 = vld [vmem:[#allocation6] ss:$0 sm:$0xff] }
  0x6e   : > { %2927 = vst [vmem:[#allocation13_spill] sm:$0xff] %v2319_v1  ;;  %2928 = vst [vmem:[#allocation14_spill] sm:$0xff] %v2321_v2  ;;  %s2064_s19 = smov 1   ;;  %s2065_s14 = smov 127   ;;  %v1703_v17 = vld [vmem:[#allocation6 + $0x1] ss:$0 sm:$0xff] }
  0x6f   : > { %333 = vst.msk [vmem:[#allocation2] sm:$0xff] %vm332_vm1, %v2319_v1  ;;  %334 = vst.msk [vmem:[#allocation2 + $0x8] sm:$0xff] %vm332_vm1, %v2321_v2  ;;  %s2897_s21 = smov 126   ;;  %s2067_s23 = smov 125   ;;  %v1702_v18 = vld [vmem:[#allocation6 + $0x1e] ss:$0 sm:$0xff] }
  0x70   : > { %371 = vrot.lane.b32.xlu1 %v2057_v0, %s2060_s29  ;;  %s2068_s18 = smov 124   ;;  %s2903_s13 = smov 123   ;;  %v1705_v19 = vld [vmem:[#allocation6 + $0x1f] ss:$0 sm:$0xff]  ;;  %v1706_v24 = vld [vmem:[#allocation6 + $0x2] ss:$0 sm:$0xff] }
  0x71   : > { %s2901_s22 = smov 122   ;;  %v1708_v27 = vld [vmem:[#allocation6 + $0x20] ss:$0 sm:$0xff]  ;;  %v1701_v34 = vld [vmem:[#allocation6 + $0xf] ss:$0 sm:$0xff]  ;;  %p2950_p0 = scmp.ne.s32.totalorder %s2921_s16, 0 }
  0x72   : > { %v1704_v35 = vld [vmem:[#allocation6 + $0x10] ss:$0 sm:$0xff]  ;;  %v1707_v38 = vld [vmem:[#allocation6 + $0x11] ss:$0 sm:$0xff]  ;;  %v1709_v60 = vld [vmem:[#allocation6 + $0x3] ss:$0 sm:$0xff] }
  0x73   : > { %v1710_v61 = vld [vmem:[#allocation6 + $0x12] ss:$0 sm:$0xff]  ;;  %v1711_v62 = vld [vmem:[#allocation6 + $0x21] ss:$0 sm:$0xff] }
  0x76   : > { %v2327_v3 = vld [vmem:[#allocation2] sm:$0xff]  ;;  %v2333_v4 = vld [vmem:[#allocation2 + $0x8] sm:$0xff] }
  0x77   : > { %338 = vrot.lane.b32.xlu0 %v2327_v3, %s2058_s9  ;;  %367 = vrot.lane.b32.xlu1 %v2327_v3, %s2060_s29 }
  0x7b   : > { %340 = vrot.lane.b32.xlu0 %v2333_v4, %s2058_s9  ;;  %406 = vrot.lane.b32.xlu1 %v2333_v4, %s2059_s30 }
  0x7f   : > { %369 = vrot.lane.b32.xlu0 %v2333_v4, %s2060_s29  ;;  %441 = vrot.lane.b32.xlu1 %v2327_v3, %s2061_s11 }
  0x83   : > { %404 = vrot.lane.b32.xlu0 %v2327_v3, %s2059_s30  ;;  %445 = vrot.lane.b32.xlu1 %v2057_v0, %s2061_s11 }
  0x87   : > { %443 = vrot.lane.b32.xlu0 %v2333_v4, %s2061_s11  ;;  %480 = vrot.lane.b32.xlu1 %v2333_v4, %s2062_s10 }
  0x8b   : > { %478 = vrot.lane.b32.xlu0 %v2327_v3, %s2062_s10  ;;  %515 = vrot.lane.b32.xlu1 %v2327_v3, %s2063_s15 }
  0x8f   : > { %482 = vrot.lane.b32.xlu0 %v2057_v0, %s2062_s10  ;;  %519 = vrot.lane.b32.xlu1 %v2057_v0, %s2063_s15 }
  0x93   : > { %517 = vrot.lane.b32.xlu0 %v2333_v4, %s2063_s15  ;;  %554 = vrot.lane.b32.xlu1 %v2333_v4, %s2064_s19 }
  0x97   : > { %552 = vrot.lane.b32.xlu0 %v2327_v3, %s2064_s19  ;;  %620 = vrot.lane.b32.xlu1 %v2327_v3, %s2065_s14 }
  0x9b   : > { %556 = vrot.lane.b32.xlu0 %v2057_v0, %s2064_s19  ;;  %624 = vrot.lane.b32.xlu1 %v2057_v0, %s2065_s14 }
  0x9f   : > { %622 = vrot.lane.b32.xlu0 %v2333_v4, %s2065_s14  ;;  %659 = vrot.lane.b32.xlu1 %v2333_v4, %s2897_s21 }
  0xa3   : > { %657 = vrot.lane.b32.xlu0 %v2327_v3, %s2897_s21  ;;  %694 = vrot.lane.b32.xlu1 %v2327_v3, %s2067_s23 }
  0xa7   : > { %661 = vrot.lane.b32.xlu0 %v2057_v0, %s2897_s21  ;;  %698 = vrot.lane.b32.xlu1 %v2057_v0, %s2067_s23  ;;  %s2899_s21 = smov 121  }
  0xab   : > { %696 = vrot.lane.b32.xlu0 %v2333_v4, %s2067_s23  ;;  %733 = vrot.lane.b32.xlu1 %v2333_v4, %s2068_s18 }
  0xaf   : > { %731 = vrot.lane.b32.xlu0 %v2327_v3, %s2068_s18  ;;  %768 = vrot.lane.b32.xlu1 %v2327_v3, %s2903_s13 }
  0xb3   : > { %735 = vrot.lane.b32.xlu0 %v2057_v0, %s2068_s18  ;;  %772 = vrot.lane.b32.xlu1 %v2057_v0, %s2903_s13 }
  0xb7   : > { %770 = vrot.lane.b32.xlu0 %v2333_v4, %s2903_s13  ;;  %807 = vrot.lane.b32.xlu1 %v2333_v4, %s2901_s22 }
  0xbb   : > { %805 = vrot.lane.b32.xlu0 %v2327_v3, %s2901_s22  ;;  %842 = vrot.lane.b32.xlu1 %v2327_v3, %s2899_s21 }
  0xbf   : > { %809 = vrot.lane.b32.xlu0 %v2057_v0, %s2901_s22  ;;  %846 = vrot.lane.b32.xlu1 %v2057_v0, %s2899_s21 }
  0xc3   : > { %844 = vrot.lane.b32.xlu0 %v2333_v4, %s2899_s21  ;;  %946 = vrot.lane.b32.xlu1 %v2057_v0, %s2060_s29  ;;  %s2929_s21 = smov 126  }
  0xc7   : > { %917 = vrot.lane.b32.xlu0 %v2057_v0, %s2058_s9  ;;  %1020 = vrot.lane.b32.xlu1 %v2057_v0, %s2061_s11 }
  0xcb   : > { %983 = vrot.lane.b32.xlu0 %v2057_v0, %s2059_s30  ;;  %1094 = vrot.lane.b32.xlu1 %v2057_v0, %s2063_s15 }
  0xcf   : > { %1057 = vrot.lane.b32.xlu0 %v2057_v0, %s2062_s10  ;;  %1199 = vrot.lane.b32.xlu1 %v2057_v0, %s2065_s14 }
  0xd3   : > { %1131 = vrot.lane.b32.xlu0 %v2057_v0, %s2064_s19  ;;  %1273 = vrot.lane.b32.xlu1 %v2057_v0, %s2067_s23 }
  0xd7   : > { %1236 = vrot.lane.b32.xlu0 %v2057_v0, %s2929_s21  ;;  %1347 = vrot.lane.b32.xlu1 %v2057_v0, %s2903_s13 }
  0xdb   : > { %1310 = vrot.lane.b32.xlu0 %v2057_v0, %s2068_s18 }
  0xde   : > { %v343_v5 = vpop.permute.xlu1 %342  ;;  %v409_v6 = vpop.permute.xlu0 %408 }
  0xdf   : > { %1384 = vrot.lane.b32.xlu0 %v2057_v0, %s2901_s22  ;;  %v351_v20 = vmul.f32 %v1700_v16, %v343_v5  ;;  %v366_v25 = vmul.f32 %v1702_v18, %v343_v5  ;;  %v417_v28 = vmul.f32 %v1706_v24, %v409_v6  ;;  %v432_v32 = vmul.f32 %v1708_v27, %v409_v6  ;;  %s2931_s22 = smov 123  }
  0xe2   : > { %v372_v7 = vpop.permute.xlu1 %371 }
  0xe3   : > { %v380_v21 = vmul.f32 %v1703_v17, %v372_v7  ;;  %v395_v26 = vmul.f32 %v1705_v19, %v372_v7 }
  0xe5   : > { %v398_v29 = vadd.f32 %v380_v21, %v351_v20  ;;  %v403_v33 = vadd.f32 %v395_v26, %v366_v25  ;;  %v1714_v26 = vld [vmem:[#allocation6 + $0x22] ss:$0 sm:$0xff] }
  0xe7   : > { %v435_v42 = vadd.f32 %v417_v28, %v398_v29  ;;  %v440_v52 = vadd.f32 %v432_v32, %v403_v33  ;;  %v2456_v33 = vld [vmem:[#allocation6 + $0x7] ss:$0 sm:$0xff] }
  0xe9   : > { %v339_v8 = vpop.permute.xlu0 %338  ;;  %v368_v9 = vpop.permute.xlu1 %367 }
  0xea   : > { %v349_v36 = vmul.f32 %v1700_v16, %v339_v8  ;;  %v378_v37 = vmul.f32 %v1703_v17, %v368_v9  ;;  %v357_v45 = vmul.f32 %v1701_v34, %v339_v8  ;;  %v364_v46 = vmul.f32 %v1702_v18, %v339_v8 }
  0xeb   : > { %v386_v47 = vmul.f32 %v1704_v35, %v368_v9  ;;  %v393_v48 = vmul.f32 %v1705_v19, %v368_v9 }
  0xec   : > { %v396_v53 = vadd.f32 %v378_v37, %v349_v36 }
  0xed   : > { %v341_v10 = vpop.permute.xlu0 %340  ;;  %v407_v11 = vpop.permute.xlu1 %406  ;;  %v399_v7 = vadd.f32 %v386_v47, %v357_v45  ;;  %v401_v8 = vadd.f32 %v393_v48, %v364_v46  ;;  %v2467_v45 = vmul.f32 %v2456_v33, %v2327_v3  ;;  %v2471_v46 = vmul.f32 %v2456_v33, %v2333_v4 }
  0xee   : > { %v350_v49 = vmul.f32 %v1700_v16, %v341_v10  ;;  %v358_v50 = vmul.f32 %v1701_v34, %v341_v10  ;;  %v365_v51 = vmul.f32 %v1702_v18, %v341_v10  ;;  %v416_v54 = vmul.f32 %v1706_v24, %v407_v11  ;;  %v2458_v34 = vld [vmem:[#allocation6 + $0x16] ss:$0 sm:$0xff] }
  0xef   : > { %v424_v55 = vmul.f32 %v1707_v38, %v407_v11  ;;  %v431_v56 = vmul.f32 %v1708_v27, %v407_v11  ;;  %v1712_v11 = vld [vmem:[#allocation6 + $0x4] ss:$0 sm:$0xff]  ;;  %v2475_v47 = vmul.f32 %v2458_v34, %v2333_v4 }
  0xf1   : > { %v370_v12 = vpop.permute.xlu0 %369  ;;  %v2435_v13 = vpop.permute.xlu1 %441 }
  0xf2   : > { %v379_v39 = vmul.f32 %v1703_v17, %v370_v12  ;;  %v387_v40 = vmul.f32 %v1704_v35, %v370_v12  ;;  %v394_v41 = vmul.f32 %v1705_v19, %v370_v12  ;;  %v452_v10 = vmul.f32 %v1709_v60, %v2435_v13  ;;  %v1713_v19 = vld [vmem:[#allocation6 + $0x13] ss:$0 sm:$0xff] }
  0xf3   : > { %v460_v20 = vmul.f32 %v1710_v61, %v2435_v13  ;;  %v467_v21 = vmul.f32 %v1711_v62, %v2435_v13 }
  0xf4   : > { %v397_v57 = vadd.f32 %v379_v39, %v350_v49  ;;  %v400_v58 = vadd.f32 %v387_v40, %v358_v50  ;;  %v402_v59 = vadd.f32 %v394_v41, %v365_v51 }
  0xf5   : > { %v405_v14 = vpop.permute.xlu0 %404  ;;  %v2437_v15 = vpop.permute.xlu1 %445 }
  0xf6   : > { %v415_v63 = vmul.f32 %v1706_v24, %v405_v14  ;;  %v423_v9 = vmul.f32 %v1707_v38, %v405_v14  ;;  %v430_v12 = vmul.f32 %v1708_v27, %v405_v14  ;;  %v454_v24 = vmul.f32 %v1709_v60, %v2437_v15 }
  0xf7   : > { %v469_v25 = vmul.f32 %v1711_v62, %v2437_v15  ;;  %v434_v29 = vadd.f32 %v416_v54, %v397_v57  ;;  %v437_v32 = vadd.f32 %v424_v55, %v400_v58  ;;  %v439_v14 = vadd.f32 %v431_v56, %v402_v59  ;;  %v1717_v58 = vld [vmem:[#allocation6 + $0x23] ss:$0 sm:$0xff] }
  0xf8   : > { %v433_v28 = vadd.f32 %v415_v63, %v396_v53  ;;  %v436_v35 = vadd.f32 %v423_v9, %v399_v7  ;;  %v438_v36 = vadd.f32 %v430_v12, %v401_v8  ;;  %v472_v41 = vadd.f32 %v454_v24, %v435_v42  ;;  %v1716_v42 = vld [vmem:[#allocation6 + $0x14] ss:$0 sm:$0xff]  ;;  %v1718_v12 = vld [vmem:[#allocation6 + $0x6] ss:$0 sm:$0xff] }
  0xf9   : > { %v444_v22 = vpop.permute.xlu0 %443  ;;  %v2439_v23 = vpop.permute.xlu1 %480  ;;  %v477_v48 = vadd.f32 %v469_v25, %v440_v52  ;;  %v1720_v25 = vld [vmem:[#allocation6 + $0x24] ss:$0 sm:$0xff] }
  0xfa   : > { %v453_v16 = vmul.f32 %v1709_v60, %v444_v22  ;;  %v461_v17 = vmul.f32 %v1710_v61, %v444_v22  ;;  %v468_v18 = vmul.f32 %v1711_v62, %v444_v22  ;;  %v490_v13 = vmul.f32 %v1712_v11, %v2439_v23 }
  0xfb   : > { %v498_v37 = vmul.f32 %v1713_v19, %v2439_v23  ;;  %v505_v40 = vmul.f32 %v1714_v26, %v2439_v23  ;;  %v470_v49 = vadd.f32 %v452_v10, %v433_v28  ;;  %v1715_v23 = vld [vmem:[#allocation6 + $0x5] ss:$0 sm:$0xff]  ;;  %v473_v55 = vadd.f32 %v460_v20, %v436_v35 }
  0xfc   : > { %v471_v38 = vadd.f32 %v453_v16, %v434_v29  ;;  %v474_v15 = vadd.f32 %v461_v17, %v437_v32  ;;  %v476_v39 = vadd.f32 %v468_v18, %v439_v14  ;;  %v475_v56 = vadd.f32 %v467_v21, %v438_v36  ;;  %v1719_v18 = vld [vmem:[#allocation6 + $0x15] ss:$0 sm:$0xff] }
  0xfd   : > { %v2441_v30 = vpop.permute.xlu0 %478  ;;  %v2443_v31 = vpop.permute.xlu1 %515 }
  0xfe   : > { %v489_v50 = vmul.f32 %v1712_v11, %v2441_v30  ;;  %v497_v51 = vmul.f32 %v1713_v19, %v2441_v30  ;;  %v504_v57 = vmul.f32 %v1714_v26, %v2441_v30  ;;  %v508_v60 = vadd.f32 %v490_v13, %v471_v38 }
  0xff   : > { %v511_v61 = vadd.f32 %v498_v37, %v474_v15  ;;  %v513_v52 = vadd.f32 %v505_v40, %v476_v39  ;;  %v526_v63 = vmul.f32 %v1715_v23, %v2443_v31  ;;  %v534_v7 = vmul.f32 %v1716_v42, %v2443_v31 }
 0x100   : > { %v507_v10 = vadd.f32 %v489_v50, %v470_v49  ;;  %v510_v16 = vadd.f32 %v497_v51, %v473_v55  ;;  %v541_v17 = vmul.f32 %v1717_v58, %v2443_v31  ;;  %v512_v20 = vadd.f32 %v504_v57, %v475_v56 }
 0x101   : > { %v2445_v43 = vpop.permute.xlu0 %482  ;;  %v2447_v44 = vpop.permute.xlu1 %519  ;;  %v602_v40 = vmul.f32 %v2458_v34, %v2327_v3 }
 0x102   : > { %v491_v59 = vmul.f32 %v1712_v11, %v2445_v43  ;;  %v506_v62 = vmul.f32 %v1714_v26, %v2445_v43  ;;  %v528_v43 = vmul.f32 %v1715_v23, %v2447_v44  ;;  %v543_v24 = vmul.f32 %v1717_v58, %v2447_v44 }
 0x103   : > { %v544_v36 = vadd.f32 %v526_v63, %v507_v10  ;;  %v547_v13 = vadd.f32 %v534_v7, %v510_v16  ;;  %v549_v44 = vadd.f32 %v541_v17, %v512_v20 }
 0x104   : > { %v509_v21 = vadd.f32 %v491_v59, %v472_v41  ;;  %v514_v26 = vadd.f32 %v506_v62, %v477_v48  ;;  %v1723_v41 = vld [vmem:[#allocation6 + $0x25] ss:$0 sm:$0xff] }
 0x105   : > { %v518_v5 = vpop.permute.xlu0 %517  ;;  %v2449_v6 = vpop.permute.xlu1 %554  ;;  %v610_v34 = vmul.f32 %v1723_v41, %v2333_v4  ;;  %v611_v7 = vmul.f32 0.0, %v1723_v41 }
 0x106   : > { %v527_v8 = vmul.f32 %v1715_v23, %v518_v5  ;;  %v535_v9 = vmul.f32 %v1716_v42, %v518_v5  ;;  %v542_v30 = vmul.f32 %v1717_v58, %v518_v5  ;;  %v564_v28 = vmul.f32 %v1718_v12, %v2449_v6  ;;  %v1725_v58 = vld [vmem:[#allocation6 + $0x17] ss:$0 sm:$0xff] }
 0x107   : > { %v572_v5 = vmul.f32 %v1719_v18, %v2449_v6  ;;  %v579_v38 = vmul.f32 %v1720_v25, %v2449_v6  ;;  %v546_v50 = vadd.f32 %v528_v43, %v509_v21  ;;  %v551_v42 = vadd.f32 %v543_v24, %v514_v26  ;;  %v1724_v6 = vld [vmem:[#allocation6 + $0x8] ss:$0 sm:$0xff] }
 0x108   : > { %v545_v14 = vadd.f32 %v527_v8, %v508_v60  ;;  %v548_v31 = vadd.f32 %v535_v9, %v511_v61  ;;  %v550_v37 = vadd.f32 %v542_v30, %v513_v52  ;;  %v1726_v60 = vld [vmem:[#allocation6 + $0x26] ss:$0 sm:$0xff]  ;;  %v596_v61 = vmul.f32 0.0, %v2456_v33 }
 0x109   : > { %v553_v27 = vpop.permute.xlu0 %552  ;;  %v2460_v22 = vpop.permute.xlu1 %620  ;;  %v882_v8 = vlaneseq }
 0x10a   : > { %v563_v29 = vmul.f32 %v1718_v12, %v553_v27  ;;  %v571_v32 = vmul.f32 %v1719_v18, %v553_v27  ;;  %v578_v35 = vmul.f32 %v1720_v25, %v553_v27  ;;  %v609_v27 = vmul.f32 %v1723_v41, %v2327_v3  ;;  %v1732_v41 = vld [vmem:[#allocation6 + $0x28] ss:$0 sm:$0xff] }
 0x10b   : > { %v582_v55 = vadd.f32 %v564_v28, %v545_v14  ;;  %v585_v56 = vadd.f32 %v572_v5, %v548_v31  ;;  %v587_v59 = vadd.f32 %v579_v38, %v550_v37  ;;  %v639_v10 = vmul.f32 %v1725_v58, %v2460_v22 }
 0x10c   : > { %v581_v51 = vadd.f32 %v563_v29, %v544_v36  ;;  %v584_v23 = vadd.f32 %v571_v32, %v547_v13  ;;  %v586_v57 = vadd.f32 %v578_v35, %v549_v44  ;;  %v646_v17 = vmul.f32 %v1726_v60, %v2460_v22  ;;  %v1729_v29 = vld [vmem:[#allocation6 + $0x27] ss:$0 sm:$0xff]  ;;  %v1730_v36 = vld [vmem:[#allocation6 + $0xa] ss:$0 sm:$0xff]  ;;  %v1731_v13 = vld [vmem:[#allocation6 + $0x19] ss:$0 sm:$0xff] }
 0x10d   : > { %v557_v53 = vpop.permute.xlu0 %556  ;;  %v2479_v54 = vpop.permute.xlu1 %624  ;;  %v613_v33 = vadd.f32 %v2471_v46, %v582_v55  ;;  %v616_v4 = vadd.f32 %v2475_v47, %v585_v56  ;;  %v618_v20 = vadd.f32 %v610_v34, %v587_v59  ;;  %v1728_v46 = vld [vmem:[#allocation6 + $0x18] ss:$0 sm:$0xff] }
 0x10e   : > { %v565_v48 = vmul.f32 %v1718_v12, %v557_v53  ;;  %v580_v49 = vmul.f32 %v1720_v25, %v557_v53  ;;  %v612_v3 = vadd.f32 %v2467_v45, %v581_v51  ;;  %v615_v9 = vadd.f32 %v602_v40, %v584_v23  ;;  %v1727_v45 = vld [vmem:[#allocation6 + $0x9] ss:$0 sm:$0xff] }
 0x10f   : > { %v631_v12 = vmul.f32 %v1724_v6, %v2460_v22  ;;  %v617_v16 = vadd.f32 %v609_v27, %v586_v57  ;;  %v633_v30 = vmul.f32 %v1724_v6, %v2479_v54  ;;  %v648_v18 = vmul.f32 %v1726_v60, %v2479_v54 }
 0x110   : > { %v583_v53 = vadd.f32 %v565_v48, %v546_v50  ;;  %v588_v63 = vadd.f32 %v580_v49, %v551_v42  ;;  %v652_v32 = vadd.f32 %v639_v10, %v615_v9 }
 0x111   : > { %v2487_v19 = vpop.permute.xlu0 %622  ;;  %v2489_v11 = vpop.permute.xlu1 %659  ;;  %v649_v47 = vadd.f32 %v631_v12, %v612_v3  ;;  %v654_v54 = vadd.f32 %v646_v17, %v617_v16  ;;  %v1734_v12 = vld [vmem:[#allocation6 + $0x1a] ss:$0 sm:$0xff] }
 0x112   : > { %v632_v21 = vmul.f32 %v1724_v6, %v2487_v19  ;;  %v614_v25 = vadd.f32 %v596_v61, %v583_v53  ;;  %v619_v26 = vadd.f32 %v611_v7, %v588_v63  ;;  %v640_v28 = vmul.f32 %v1725_v58, %v2487_v19 }
 0x113   : > { %v647_v22 = vmul.f32 %v1726_v60, %v2487_v19  ;;  %v669_v5 = vmul.f32 %v1727_v45, %v2489_v11  ;;  %v677_v44 = vmul.f32 %v1728_v46, %v2489_v11  ;;  %v684_v40 = vmul.f32 %v1729_v29, %v2489_v11 }
 0x114   : > { %v650_v38 = vadd.f32 %v632_v21, %v613_v33  ;;  %v651_v50 = vadd.f32 %v633_v30, %v614_v25  ;;  %v656_v51 = vadd.f32 %v648_v18, %v619_v26  ;;  %v653_v23 = vadd.f32 %v640_v28, %v616_v4  ;;  %v1735_v4 = vld [vmem:[#allocation6 + $0x29] ss:$0 sm:$0xff] }
 0x115   : > { %v658_v15 = vpop.permute.xlu0 %657  ;;  %v2496_v39 = vpop.permute.xlu1 %694  ;;  %v655_v27 = vadd.f32 %v647_v22, %v618_v20  ;;  %v1738_v22 = vld [vmem:[#allocation6 + $0x2a] ss:$0 sm:$0xff] }
 0x116   : > { %v668_v14 = vmul.f32 %v1727_v45, %v658_v15  ;;  %v676_v31 = vmul.f32 %v1728_v46, %v658_v15  ;;  %v683_v35 = vmul.f32 %v1729_v29, %v658_v15  ;;  %v705_v15 = vmul.f32 %v1730_v36, %v2496_v39 }
 0x117   : > { %v713_v56 = vmul.f32 %v1731_v13, %v2496_v39  ;;  %v720_v6 = vmul.f32 %v1732_v41, %v2496_v39  ;;  %v687_v11 = vadd.f32 %v669_v5, %v650_v38  ;;  %v690_v7 = vadd.f32 %v677_v44, %v653_v23  ;;  %v1736_v39 = vld [vmem:[#allocation6 + $0xc] ss:$0 sm:$0xff] }
 0x118   : > { %v686_v42 = vadd.f32 %v668_v14, %v649_v47  ;;  %v689_v55 = vadd.f32 %v676_v31, %v652_v32  ;;  %v691_v57 = vadd.f32 %v683_v35, %v654_v54  ;;  %v692_v3 = vadd.f32 %v684_v40, %v655_v27 }
 0x119   : > { %v662_v52 = vpop.permute.xlu0 %661  ;;  %v699_v62 = vpop.permute.xlu1 %698  ;;  %v2526_v27 = vshrl.u32 %v882_v8, 7 }
 0x11a   : > { %v670_v37 = vmul.f32 %v1727_v45, %v662_v52  ;;  %v685_v19 = vmul.f32 %v1729_v29, %v662_v52  ;;  %v707_v59 = vmul.f32 %v1730_v36, %v699_v62  ;;  %v722_v61 = vmul.f32 %v1732_v41, %v699_v62  ;;  %v1733_v52 = vld [vmem:[#allocation6 + $0xb] ss:$0 sm:$0xff]  ;;  %v1737_v45 = vld [vmem:[#allocation6 + $0x1b] ss:$0 sm:$0xff] }
 0x11b   : > { %v723_v16 = vadd.f32 %v705_v15, %v686_v42  ;;  %v726_v17 = vadd.f32 %v713_v56, %v689_v55  ;;  %v728_v18 = vadd.f32 %v720_v6, %v691_v57  ;;  %2930 = vst [vmem:[#allocation15_spill] sm:$0xff] %v2526_v27  ;;  %vm884_vm2 = vcmp.lt.s32.totalorder %v2526_v27, 1 }
 0x11c   : > { %v688_v58 = vadd.f32 %v670_v37, %v651_v50  ;;  %v693_v60 = vadd.f32 %v685_v19, %v656_v51  ;;  %v1742_v51 = vld [vmem:[#allocation6 + $0xe] ss:$0 sm:$0xff]  ;;  %vm892_vm3 = vcmp.lt.s32.totalorder %v2526_v27, 7  ;;  %v1753_v27 = vld [vmem:[#allocation8 + $0x11] ss:$0 sm:$0xff] }
 0x11d   : > { %v697_v43 = vpop.permute.xlu0 %696  ;;  %v2512_v24 = vpop.permute.xlu1 %733 }
 0x11e   : > { %v706_v34 = vmul.f32 %v1730_v36, %v697_v43  ;;  %v714_v9 = vmul.f32 %v1731_v13, %v697_v43  ;;  %v721_v33 = vmul.f32 %v1732_v41, %v697_v43  ;;  %v725_v20 = vadd.f32 %v707_v59, %v688_v58 }
 0x11f   : > { %v730_v25 = vadd.f32 %v722_v61, %v693_v60  ;;  %v743_v28 = vmul.f32 %v1733_v52, %v2512_v24  ;;  %v751_v14 = vmul.f32 %v1734_v12, %v2512_v24  ;;  %v758_v5 = vmul.f32 %v1735_v4, %v2512_v24  ;;  %v1741_v24 = vld [vmem:[#allocation6 + $0x2b] ss:$0 sm:$0xff]  ;;  %v1740_v60 = vld [vmem:[#allocation6 + $0x1c] ss:$0 sm:$0xff] }
 0x120   : > { %v724_v26 = vadd.f32 %v706_v34, %v687_v11  ;;  %v727_v32 = vadd.f32 %v714_v9, %v690_v7  ;;  %v729_v54 = vadd.f32 %v721_v33, %v692_v3  ;;  %v1744_v34 = vld [vmem:[#allocation6 + $0x2c] ss:$0 sm:$0xff] }
 0x121   : > { %v732_v48 = vpop.permute.xlu0 %731  ;;  %v769_v49 = vpop.permute.xlu1 %768 }
 0x122   : > { %v742_v10 = vmul.f32 %v1733_v52, %v732_v48  ;;  %v750_v30 = vmul.f32 %v1734_v12, %v732_v48  ;;  %v757_v21 = vmul.f32 %v1735_v4, %v732_v48  ;;  %v779_v31 = vmul.f32 %v1736_v39, %v769_v49  ;;  %v1739_v48 = vld [vmem:[#allocation6 + $0xd] ss:$0 sm:$0xff] }
 0x123   : > { %v787_v36 = vmul.f32 %v1737_v45, %v769_v49  ;;  %v794_v37 = vmul.f32 %v1738_v22, %v769_v49  ;;  %v761_v40 = vadd.f32 %v743_v28, %v724_v26  ;;  %v764_v42 = vadd.f32 %v751_v14, %v727_v32 }
 0x124   : > { %v760_v43 = vadd.f32 %v742_v10, %v723_v16  ;;  %v763_v35 = vadd.f32 %v750_v30, %v726_v17  ;;  %v765_v13 = vadd.f32 %v757_v21, %v728_v18  ;;  %v766_v57 = vadd.f32 %v758_v5, %v729_v54  ;;  %v1743_v16 = vld [vmem:[#allocation6 + $0x1d] ss:$0 sm:$0xff] }
 0x125   : > { %v736_v53 = vpop.permute.xlu0 %735  ;;  %v773_v63 = vpop.permute.xlu1 %772 }
 0x126   : > { %v744_v62 = vmul.f32 %v1733_v52, %v736_v53  ;;  %v759_v46 = vmul.f32 %v1735_v4, %v736_v53  ;;  %v781_v44 = vmul.f32 %v1736_v39, %v773_v63  ;;  %v796_v19 = vmul.f32 %v1738_v22, %v773_v63 }
 0x127   : > { %v797_v55 = vadd.f32 %v779_v31, %v760_v43  ;;  %v800_v6 = vadd.f32 %v787_v36, %v763_v35  ;;  %v802_v59 = vadd.f32 %v794_v37, %v765_v13 }
 0x128   : > { %v762_v38 = vadd.f32 %v744_v62, %v725_v20  ;;  %v767_v41 = vadd.f32 %v759_v46, %v730_v25 }
 0x129   : > { %v771_v29 = vpop.permute.xlu0 %770  ;;  %v808_v47 = vpop.permute.xlu1 %807 }
 0x12a   : > { %v780_v15 = vmul.f32 %v1736_v39, %v771_v29  ;;  %v795_v49 = vmul.f32 %v1738_v22, %v771_v29  ;;  %v799_v11 = vadd.f32 %v781_v44, %v762_v38  ;;  %v804_v53 = vadd.f32 %v796_v19, %v767_v41 }
 0x12b   : > { %v788_v63 = vmul.f32 %v1737_v45, %v771_v29  ;;  %v817_v7 = vmul.f32 %v1739_v48, %v808_v47  ;;  %v832_v10 = vmul.f32 %v1741_v24, %v808_v47  ;;  %v825_v28 = vmul.f32 %v1740_v60, %v808_v47 }
 0x12c   : > { %v798_v12 = vadd.f32 %v780_v15, %v761_v40  ;;  %v803_v4 = vadd.f32 %v795_v49, %v766_v57 }
 0x12d   : > { %v806_v50 = vpop.permute.xlu0 %805  ;;  %v843_v23 = vpop.permute.xlu1 %842  ;;  %v801_v26 = vadd.f32 %v788_v63, %v764_v42 }
 0x12e   : > { %v816_v56 = vmul.f32 %v1739_v48, %v806_v50  ;;  %v831_v58 = vmul.f32 %v1741_v24, %v806_v50  ;;  %v853_v52 = vmul.f32 %v1742_v51, %v843_v23  ;;  %v824_v8 = vmul.f32 %v1740_v60, %v806_v50 }
 0x12f   : > { %v868_v39 = vmul.f32 %v1744_v34, %v843_v23  ;;  %v861_v22 = vmul.f32 %v1743_v16, %v843_v23  ;;  %v835_v29 = vadd.f32 %v817_v7, %v798_v12  ;;  %v840_v43 = vadd.f32 %v832_v10, %v803_v4  ;;  %v2607_v12 = vld [vmem:[#allocation8 + $0x1] ss:$0 sm:$0xff] }
 0x130   : > { %v834_v61 = vadd.f32 %v816_v56, %v797_v55  ;;  %v839_v30 = vadd.f32 %v831_v58, %v802_v59  ;;  %v837_v45 = vadd.f32 %v824_v8, %v800_v6  ;;  %v838_v38 = vadd.f32 %v825_v28, %v801_v26  ;;  %v1745_v55 = vld [vmem:[%s2886_s2] ss:$0 sm:$0xff] }
 0x131   : > { %v810_v3 = vpop.permute.xlu0 %809  ;;  %v847_v9 = vpop.permute.xlu1 %846 }
 0x132   : > { %v818_v17 = vmul.f32 %v1739_v48, %v810_v3  ;;  %v833_v33 = vmul.f32 %v1741_v24, %v810_v3  ;;  %v855_v18 = vmul.f32 %v1742_v51, %v847_v9  ;;  %v871_v20 = vadd.f32 %v853_v52, %v834_v61 }
 0x133   : > { %v870_v25 = vmul.f32 %v1744_v34, %v847_v9  ;;  %v876_v31 = vadd.f32 %v868_v39, %v839_v30  ;;  %v874_v44 = vadd.f32 %v861_v22, %v837_v45  ;;  %v2605_v9 = vld [vmem:[#allocation8] ss:$0 sm:$0xff]  ;;  %v2618_v39 = vld [vmem:[#allocation8 + $0x2] ss:$0 sm:$0xff]  ;;  %v2627_v22 = vld [vmem:[#allocation8 + $0x3] ss:$0 sm:$0xff] }
 0x134   : > { %v836_v21 = vadd.f32 %v818_v17, %v799_v11  ;;  %v841_v62 = vadd.f32 %v833_v33, %v804_v53  ;;  %v879_v35 = vrot.slane %v871_v20, 7  ;;  %v2613_v17 = vld [vmem:[#allocation8 + $0x1f] ss:$0 sm:$0xff]  ;;  %v2621_v20 = vld [vmem:[#allocation8 + $0x20] ss:$0 sm:$0xff] }
 0x135   : > { %v845_v46 = vpop.permute.xlu0 %844  ;;  %v889_v19 = vrot.slane %v876_v31, 1  ;;  %v947_v53 = vpop.permute.xlu1 %946 }
 0x136   : > { %v873_v32 = vadd.f32 %v855_v18, %v836_v21  ;;  %v854_v14 = vmul.f32 %v1742_v51, %v845_v46  ;;  %v862_v54 = vmul.f32 %v1743_v16, %v845_v46  ;;  %v869_v5 = vmul.f32 %v1744_v34, %v845_v46  ;;  %v2611_v16 = vld [vmem:[#allocation8 + $0x1e] ss:$0 sm:$0xff]  ;;  %v2629_v46 = vld [vmem:[#allocation8 + $0x21] ss:$0 sm:$0xff] }
 0x137   : > { %v878_v36 = vadd.f32 %v870_v25, %v841_v62  ;;  %v955_v4 = vmul.f32 %v2607_v12, %v947_v53  ;;  %v970_v18 = vmul.f32 %v2613_v17, %v947_v53  ;;  %v2667_v53 = vld [vmem:[#allocation8 + $0x25] ss:$0 sm:$0xff] }
 0x138   : > { %v881_v13 = vrot.slane %v873_v32, 7  ;;  %v872_v37 = vadd.f32 %v854_v14, %v835_v29  ;;  %v877_v40 = vadd.f32 %v869_v5, %v840_v43  ;;  %v875_v50 = vadd.f32 %v862_v54, %v838_v38  ;;  %v2632_v14 = vld [vmem:[#allocation8 + $0x4] ss:$0 sm:$0xff]  ;;  %v2637_v5 = vld [vmem:[#allocation8 + $0x22] ss:$0 sm:$0xff] }
 0x139   : > { %v891_v23 = vrot.slane %v878_v36, 1  ;;  %v918_v34 = vpop.permute.xlu0 %917  ;;  %v1021_v7 = vpop.permute.xlu1 %1020 }
 0x13a   : > { %v886_v47 = vsel %vm884_vm2, %v881_v13, %v879_v35  ;;  %v880_v41 = vrot.slane %v872_v37, 7  ;;  %v890_v51 = vrot.slane %v877_v40, 1  ;;  %v941_v30 = vmul.f32 %v2611_v16, %v918_v34  ;;  %v2645_v40 = vld [vmem:[#allocation8 + $0x23] ss:$0 sm:$0xff] }
 0x13b   : > { %v887_v48 = vadd.f32 %v886_v47, %v874_v44  ;;  %v1029_v32 = vmul.f32 %v2627_v22, %v1021_v7  ;;  %v1044_v31 = vmul.f32 %v2629_v46, %v1021_v7  ;;  %v2643_v44 = vld [vmem:[#allocation8 + $0x5] ss:$0 sm:$0xff]  ;;  %v1893_v7 = vld [vmem:[#allocation2 + $0x10] sm:$0xff] }
 0x13c   : > { %v885_v42 = vsel %vm884_vm2, %v879_v35, %v880_v41  ;;  %v894_v24 = vsel %vm892_vm3, %v889_v19, %v890_v51  ;;  %v893_v56 = vsel %vm892_vm3, %v890_v51, %v891_v23  ;;  %v978_v45 = vadd.f32 %v970_v18, %v941_v30 }
 0x13d   : > { %v888_v15 = vadd.f32 %v885_v42, %v875_v50  ;;  %v895_v57 = vadd.f32 %v894_v24, %v887_v48  ;;  %v984_v52 = vpop.permute.xlu0 %983  ;;  %v1095_v3 = vpop.permute.xlu1 %1094  ;;  %v2648_v50 = vld [vmem:[#allocation8 + $0x6] ss:$0 sm:$0xff]  ;;  %v2651_v42 = vld [vmem:[#allocation8 + $0x24] ss:$0 sm:$0xff] }
 0x13e   : > { %v992_v62 = vmul.f32 %v2618_v39, %v984_v52  ;;  %v1007_v28 = vmul.f32 %v2621_v20, %v984_v52  ;;  %v1103_v19 = vmul.f32 %v2643_v44, %v1095_v3  ;;  %v1118_v23 = vmul.f32 %v2645_v40, %v1095_v3  ;;  %v2665_v52 = vld [vmem:[#allocation8 + $0x7] ss:$0 sm:$0xff] }
 0x13f   : > { %v896_v6 = vadd.f32 %v893_v56, %v888_v15  ;;  %v904_v49 = vadd.f32 %v1745_v55, %v895_v57  ;;  %v2654_v56 = vld [vmem:[#allocation8 + $0x8] ss:$0 sm:$0xff]  ;;  %v2656_v57 = vld [vmem:[#allocation8 + $0x26] ss:$0 sm:$0xff]  ;;  %v1171_v3 = vmul.f32 %v1893_v7, %v2665_v52 }
 0x140   : > { %v1015_v43 = vadd.f32 %v1007_v28, %v978_v45  ;;  %v1747_v28 = vld [vmem:[#allocation8 + $0xf] ss:$0 sm:$0xff] }
 0x141   : > { %v905_v58 = vadd.f32 %v1745_v55, %v896_v6  ;;  %v906_v59 = vmax.f32 %v904_v49, 0.0  ;;  %v1058_v63 = vpop.permute.xlu0 %1057  ;;  %v1200_v33 = vpop.permute.xlu1 %1199 }
 0x142   : > { %v1066_v36 = vmul.f32 %v2632_v14, %v1058_v63  ;;  %v1081_v37 = vmul.f32 %v2637_v5, %v1058_v63  ;;  %v1052_v38 = vadd.f32 %v1044_v31, %v1015_v43  ;;  %v2669_v63 = vld [vmem:[#allocation8 + $0x27] ss:$0 sm:$0xff]  ;;  %v1750_v31 = vld [vmem:[#allocation8 + $0x10] ss:$0 sm:$0xff] }
 0x143   : > { %v907_v11 = vmax.f32 %v905_v58, 0.0  ;;  %908 = vst.msk [vmem:[#allocation2] sm:$0xff] %vm332_vm1, %v906_v59  ;;  %v2659_v59 = vld [vmem:[#allocation8 + $0xa] ss:$0 sm:$0xff]  ;;  %2937 = vst [vmem:[#allocation19_spill] sm:$0xff] %v2669_v63 }
 0x144   : > { %v1089_v51 = vadd.f32 %v1081_v37, %v1052_v38  ;;  %2935 = vst [vmem:[#allocation17_spill] sm:$0xff] %v2659_v59 }
 0x145   : > { %909 = vst.msk [vmem:[#allocation2 + $0x8] sm:$0xff] %vm332_vm1, %v907_v11  ;;  %v1132_v8 = vpop.permute.xlu0 %1131  ;;  %v1274_v26 = vpop.permute.xlu1 %1273  ;;  %v2661_v11 = vld [vmem:[#allocation8 + $0x28] ss:$0 sm:$0xff] }
 0x146   : > { %v1140_v15 = vmul.f32 %v2648_v50, %v1132_v8  ;;  %v1155_v49 = vmul.f32 %v2651_v42, %v1132_v8  ;;  %v1126_v58 = vadd.f32 %v1118_v23, %v1089_v51  ;;  %2936 = vst [vmem:[#allocation18_spill] sm:$0xff] %v2661_v11  ;;  %v2676_v8 = vmul.f32 %v2654_v56, %v1200_v33 }
 0x149   : > { %v2609_v10 = vpop.permute.xlu0 %1236  ;;  %v2639_v35 = vpop.permute.xlu1 %1347 }
 0x14a   : > { %v2543_v60 = vld [vmem:[#allocation2] sm:$0xff] }
 0x14b   : > { %913 = vrot.lane.b32.xlu0 %v2543_v60, %s2058_s9 }
 0x14c   : > { %v2545_v61 = vld [vmem:[#allocation2 + $0x8] sm:$0xff] }
 0x14d   : > { %915 = vrot.lane.b32.xlu1 %v2545_v61, %s2058_s9  ;;  %s2932_s9 = smov 122   ;;  %v2623_v21 = vpop.permute.xlu0 %1310 }
 0x14f   : > { %944 = vrot.lane.b32.xlu0 %v2545_v61, %s2060_s29 }
 0x151   : > { %942 = vrot.lane.b32.xlu1 %v2543_v60, %s2060_s29  ;;  %v2635_v54 = vpop.permute.xlu0 %1384  ;;  %s2072_s29 = smov [#allocation9]  }
 0x152   : > { %2934 = vst [vmem:[#allocation16_spill] sm:$0xff] %v2635_v54 }
 0x153   : > { %979 = vrot.lane.b32.xlu0 %v2543_v60, %s2059_s30 }
 0x155   : > { %981 = vrot.lane.b32.xlu1 %v2545_v61, %s2059_s30  ;;  %s2933_s30 = smov 121  }
 0x157   : > { %1018 = vrot.lane.b32.xlu0 %v2545_v61, %s2061_s11 }
 0x159   : > { %1016 = vrot.lane.b32.xlu1 %v2543_v60, %s2061_s11  ;;  %s1984_s11 = sshll.u32 %s2072_s29, 4  ;;  %s1985_s11 = int_to_ptr.vmem [resolvable:$false] %s1984_s11 }
 0x15b   : > { %1053 = vrot.lane.b32.xlu0 %v2543_v60, %s2062_s10 }
 0x15d   : > { %1055 = vrot.lane.b32.xlu1 %v2545_v61, %s2062_s10 }
 0x15f   : > { %1092 = vrot.lane.b32.xlu0 %v2545_v61, %s2063_s15 }
 0x161   : > { %1090 = vrot.lane.b32.xlu1 %v2543_v60, %s2063_s15 }
 0x163   : > { %1127 = vrot.lane.b32.xlu0 %v2543_v60, %s2064_s19 }
 0x165   : > { %1129 = vrot.lane.b32.xlu1 %v2545_v61, %s2064_s19 }
 0x167   : > { %1197 = vrot.lane.b32.xlu0 %v2545_v61, %s2065_s14 }
 0x169   : > { %1195 = vrot.lane.b32.xlu1 %v2543_v60, %s2065_s14 }
 0x16b   : > { %1232 = vrot.lane.b32.xlu0 %v2543_v60, %s2929_s21 }
 0x16d   : > { %1234 = vrot.lane.b32.xlu1 %v2545_v61, %s2929_s21 }
 0x16f   : > { %1271 = vrot.lane.b32.xlu0 %v2545_v61, %s2067_s23 }
 0x171   : > { %1269 = vrot.lane.b32.xlu1 %v2543_v60, %s2067_s23 }
 0x173   : > { %1306 = vrot.lane.b32.xlu0 %v2543_v60, %s2068_s18 }
 0x175   : > { %1308 = vrot.lane.b32.xlu1 %v2545_v61, %s2068_s18 }
 0x177   : > { %1345 = vrot.lane.b32.xlu0 %v2545_v61, %s2931_s22 }
 0x179   : > { %1343 = vrot.lane.b32.xlu1 %v2543_v60, %s2931_s22 }
 0x17b   : > { %1380 = vrot.lane.b32.xlu0 %v2543_v60, %s2932_s9 }
 0x17d   : > { %1382 = vrot.lane.b32.xlu1 %v2545_v61, %s2932_s9 }
 0x17f   : > { %1419 = vrot.lane.b32.xlu0 %v2545_v61, %s2933_s30 }
 0x181   : > { %1417 = vrot.lane.b32.xlu1 %v2543_v60, %s2933_s30 }
 0x185   : > { %1421 = vrot.lane.b32.xlu1 %v2057_v0, %s2933_s30  ;;  %v926_v0 = vmul.f32 %v2605_v9, %v918_v34  ;;  %v2663_v34 = vld [vmem:[#allocation8 + $0x9] ss:$0 sm:$0xff] }
 0x186   : > { %v2690_v43 = vmul.f32 %v2663_v34, %v2609_v10 }
 0x187   : > { %v973_v25 = vadd.f32 %v955_v4, %v926_v0  ;;  %v2673_v0 = vmul.f32 %v1893_v7, %v2667_v53  ;;  %v2679_v4 = vmul.f32 %v2656_v57, %v1200_v33  ;;  %v2705_v7 = vld [vmem:[#allocation8 + $0xc] ss:$0 sm:$0xff] }
 0x189   : > { %v1010_v29 = vadd.f32 %v992_v62, %v973_v25  ;;  %v2682_v62 = vmul.f32 %v2659_v59, %v1274_v26  ;;  %v2685_v25 = vmul.f32 %v2661_v11, %v1274_v26 }
 0x18b   : > { %v1047_v13 = vadd.f32 %v1029_v32, %v1010_v29  ;;  %2938 = vst [vmem:[#allocation20_spill] sm:$0xff] %v2682_v62  ;;  %2939 = vst [vmem:[#allocation21_spill] sm:$0xff] %v2685_v25  ;;  %v1163_v32 = vadd.f32 %v1155_v49, %v1126_v58  ;;  %v1756_v62 = vld [vmem:[#allocation8 + $0x12] ss:$0 sm:$0xff] }
 0x18d   : > { %v1084_v41 = vadd.f32 %v1066_v36, %v1047_v13  ;;  %v2696_v13 = vmul.f32 %v2669_v63, %v2609_v10 }
 0x18f   : > { %v1121_v24 = vadd.f32 %v1103_v19, %v1084_v41 }
 0x191   : > { %v1158_v18 = vadd.f32 %v1140_v15, %v1121_v24 }
 0x1bd   : > { %v914_v47 = vpop.permute.xlu0 %913 }
 0x1be   : > { %v924_v41 = vmul.f32 %v2605_v9, %v914_v47  ;;  %v932_v19 = vmul.f32 %v1747_v28, %v914_v47 }
 0x1bf   : > { %v916_v48 = vpop.permute.xlu1 %915 }
 0x1c0   : > { %v925_v26 = vmul.f32 %v2605_v9, %v916_v48  ;;  %v940_v51 = vmul.f32 %v2611_v16, %v916_v48  ;;  %v933_v24 = vmul.f32 %v1747_v28, %v916_v48  ;;  %v1189_v28 = vadd.f32 %v1171_v3, %v1158_v18 }
 0x1c1   : > { %v945_v55 = vpop.permute.xlu0 %944 }
 0x1c2   : > { %v954_v45 = vmul.f32 %v2607_v12, %v945_v55  ;;  %v969_v33 = vmul.f32 %v2613_v17, %v945_v55  ;;  %v962_v49 = vmul.f32 %v1750_v31, %v945_v55 }
 0x1c3   : > { %v943_v6 = vpop.permute.xlu1 %942 }
 0x1c4   : > { %v953_v36 = vmul.f32 %v2607_v12, %v943_v6  ;;  %v968_v37 = vmul.f32 %v2613_v17, %v943_v6  ;;  %v939_v12 = vmul.f32 %v2611_v16, %v914_v47  ;;  %v972_v10 = vadd.f32 %v954_v45, %v925_v26 }
 0x1c5   : > { %v980_v30 = vpop.permute.xlu0 %979  ;;  %v977_v1 = vadd.f32 %v969_v33, %v940_v51  ;;  %v961_v17 = vmul.f32 %v1750_v31, %v943_v6  ;;  %v2714_v6 = vmul.f32 %v2705_v7, %v2639_v35  ;;  %v1759_v51 = vld [vmem:[#allocation8 + $0x13] ss:$0 sm:$0xff] }
 0x1c6   : > { %v971_v2 = vadd.f32 %v953_v36, %v924_v41  ;;  %v990_v9 = vmul.f32 %v2618_v39, %v980_v30  ;;  %v976_v54 = vadd.f32 %v968_v37, %v939_v12  ;;  %v1005_v25 = vmul.f32 %v2621_v20, %v980_v30 }
 0x1c7   : > { %v982_v29 = vpop.permute.xlu1 %981  ;;  %v998_v31 = vmul.f32 %v1753_v27, %v980_v30  ;;  %v1194_v30 = vadd.f32 %v2673_v0, %v1163_v32 }
 0x1c8   : > { %v991_v38 = vmul.f32 %v2618_v39, %v982_v29  ;;  %v1006_v23 = vmul.f32 %v2621_v20, %v982_v29  ;;  %v999_v11 = vmul.f32 %v1753_v27, %v982_v29  ;;  %v975_v39 = vadd.f32 %v962_v49, %v933_v24 }
 0x1c9   : > { %v1019_v15 = vpop.permute.xlu0 %1018  ;;  %v974_v29 = vadd.f32 %v961_v17, %v932_v19  ;;  %v1013_v36 = vadd.f32 %v1005_v25, %v976_v54  ;;  %v1762_v25 = vld [vmem:[#allocation8 + $0x14] ss:$0 sm:$0xff]  ;;  %v1226_v49 = vadd.f32 %v2676_v8, %v1189_v28 }
 0x1ca   : > { %v1009_v59 = vadd.f32 %v991_v38, %v972_v10  ;;  %v1014_v63 = vadd.f32 %v1006_v23, %v977_v1  ;;  %v1028_v16 = vmul.f32 %v2627_v22, %v1019_v15  ;;  %v1043_v47 = vmul.f32 %v2629_v46, %v1019_v15 }
 0x1cb   : > { %v1017_v58 = vpop.permute.xlu1 %1016  ;;  %v1008_v1 = vadd.f32 %v990_v9, %v971_v2  ;;  %v1012_v26 = vadd.f32 %v999_v11, %v975_v39  ;;  %v1036_v37 = vmul.f32 %v1756_v62, %v1019_v15  ;;  %v1011_v54 = vadd.f32 %v998_v31, %v974_v29  ;;  %v1765_v39 = vld [vmem:[#allocation8 + $0x15] ss:$0 sm:$0xff] }
 0x1cc   : > { %v1027_v48 = vmul.f32 %v2627_v22, %v1017_v58  ;;  %v1042_v45 = vmul.f32 %v2629_v46, %v1017_v58  ;;  %v1046_v38 = vadd.f32 %v1028_v16, %v1009_v59  ;;  %v1051_v3 = vadd.f32 %v1043_v47, %v1014_v63 }
 0x1cd   : > { %v1054_v55 = vpop.permute.xlu0 %1053  ;;  %v1035_v18 = vmul.f32 %v1756_v62, %v1017_v58  ;;  %v1049_v59 = vadd.f32 %v1036_v37, %v1012_v26  ;;  %v2733_v26 = vld [vmem:[#allocation8 + $0xb] ss:$0 sm:$0xff] }
 0x1ce   : > { %v1045_v41 = vadd.f32 %v1027_v48, %v1008_v1  ;;  %v1050_v12 = vadd.f32 %v1042_v45, %v1013_v36  ;;  %v1064_v46 = vmul.f32 %v2632_v14, %v1054_v55  ;;  %v1079_v19 = vmul.f32 %v2637_v5, %v1054_v55 }
 0x1cf   : > { %v1056_v20 = vpop.permute.xlu1 %1055  ;;  %v1072_v10 = vmul.f32 %v1759_v51, %v1054_v55  ;;  %v1169_v36 = vmul.f32 %v2665_v52, %v2543_v60 }
 0x1d0   : > { %v1065_v33 = vmul.f32 %v2632_v14, %v1056_v20  ;;  %v1080_v22 = vmul.f32 %v2637_v5, %v1056_v20  ;;  %v1073_v27 = vmul.f32 %v1759_v51, %v1056_v20  ;;  %v1048_v14 = vadd.f32 %v1035_v18, %v1011_v54 }
 0x1d1   : > { %v1093_v23 = vpop.permute.xlu0 %1092  ;;  %v1082_v17 = vadd.f32 %v1064_v46, %v1045_v41  ;;  %v1087_v0 = vadd.f32 %v1079_v19, %v1050_v12  ;;  %v1231_v41 = vadd.f32 %v2679_v4, %v1194_v30  ;;  %v1170_v19 = vmul.f32 %v2665_v52, %v2545_v61 }
 0x1d2   : > { %v1083_v11 = vadd.f32 %v1065_v33, %v1046_v38  ;;  %v1102_v15 = vmul.f32 %v2643_v44, %v1093_v23  ;;  %v1088_v63 = vadd.f32 %v1080_v22, %v1051_v3  ;;  %v1117_v62 = vmul.f32 %v2645_v40, %v1093_v23 }
 0x1d3   : > { %v1091_v2 = vpop.permute.xlu1 %1090  ;;  %v1086_v32 = vadd.f32 %v1073_v27, %v1049_v59  ;;  %v1110_v9 = vmul.f32 %v1762_v25, %v1093_v23  ;;  %v1185_v27 = vmul.f32 %v2667_v53, %v2545_v61  ;;  %v1263_v4 = vadd.f32 %v2690_v43, %v1226_v49  ;;  %v1771_v59 = vld [vmem:[#allocation8 + $0x17] ss:$0 sm:$0xff] }
 0x1d4   : > { %v1101_v24 = vmul.f32 %v2643_v44, %v1091_v2  ;;  %v1116_v5 = vmul.f32 %v2645_v40, %v1091_v2  ;;  %v1120_v47 = vadd.f32 %v1102_v15, %v1083_v11  ;;  %v1109_v48 = vmul.f32 %v1762_v25, %v1091_v2  ;;  %v1768_v44 = vld [vmem:[#allocation8 + $0x16] ss:$0 sm:$0xff] }
 0x1d5   : > { %v1128_v58 = vpop.permute.xlu0 %1127  ;;  %v1125_v29 = vadd.f32 %v1117_v62, %v1088_v63  ;;  %v1085_v40 = vadd.f32 %v1072_v10, %v1048_v14  ;;  %v1123_v37 = vadd.f32 %v1110_v9, %v1086_v32  ;;  %v1177_v18 = vmul.f32 %v1768_v44, %v2543_v60  ;;  %v2940_v10 = vld [vmem:[#allocation20_spill] sm:$0xff] }
 0x1d6   : > { %v1119_v8 = vadd.f32 %v1101_v24, %v1082_v17  ;;  %v1138_v55 = vmul.f32 %v2648_v50, %v1128_v58  ;;  %v1124_v31 = vadd.f32 %v1116_v5, %v1087_v0  ;;  %v1153_v1 = vmul.f32 %v2651_v42, %v1128_v58  ;;  %v2941_v0 = vld [vmem:[#allocation19_spill] sm:$0xff] }
 0x1d7   : > { %v1130_v16 = vpop.permute.xlu1 %1129  ;;  %v1122_v51 = vadd.f32 %v1109_v48, %v1085_v40  ;;  %v1146_v23 = vmul.f32 %v1765_v39, %v1128_v58  ;;  %v1319_v2 = vmul.f32 %v2733_v26, %v2623_v21  ;;  %v1178_v54 = vmul.f32 %v1768_v44, %v2545_v61 }
 0x1d8   : > { %v1139_v45 = vmul.f32 %v2648_v50, %v1130_v16  ;;  %v1154_v20 = vmul.f32 %v2651_v42, %v1130_v16  ;;  %v1147_v28 = vmul.f32 %v1765_v39, %v1130_v16  ;;  %v2737_v50 = vld [vmem:[#allocation8 + $0x29] ss:$0 sm:$0xff]  ;;  %v1184_v42 = vmul.f32 %v2667_v53, %v2543_v60 }
 0x1d9   : > { %v1198_v33 = vpop.permute.xlu0 %1197  ;;  %v1156_v12 = vadd.f32 %v1138_v55, %v1119_v8  ;;  %v1161_v30 = vadd.f32 %v1153_v1, %v1124_v31  ;;  %v2751_v60 = vmul.f32 %v2737_v50, %v2623_v21  ;;  %v1268_v53 = vadd.f32 %v2696_v13, %v1231_v41  ;;  %v1777_v1 = vld [vmem:[#allocation8 + $0x19] ss:$0 sm:$0xff] }
 0x1da   : > { %v1157_v22 = vadd.f32 %v1139_v45, %v1120_v47  ;;  %v1162_v38 = vadd.f32 %v1154_v20, %v1125_v29  ;;  %v1160_v46 = vadd.f32 %v1147_v28, %v1123_v37  ;;  %v1159_v62 = vadd.f32 %v1146_v23, %v1122_v51  ;;  %v2942_v28 = vld [vmem:[#allocation17_spill] sm:$0xff] }
 0x1db   : > { %v1196_v3 = vpop.permute.xlu1 %1195  ;;  %v1207_v24 = vmul.f32 %v2654_v56, %v1198_v33  ;;  %v1222_v61 = vmul.f32 %v2656_v57, %v1198_v33  ;;  %v1187_v14 = vadd.f32 %v1169_v36, %v1156_v12  ;;  %v1300_v5 = vadd.f32 %v2940_v10, %v1263_v4  ;;  %v1784_v4 = vld [vmem:[#allocation8 + $0x2a] ss:$0 sm:$0xff] }
 0x1dc   : > { %v1188_v25 = vadd.f32 %v1170_v19, %v1157_v22  ;;  %v1193_v15 = vadd.f32 %v1185_v27, %v1162_v38  ;;  %v1206_v52 = vmul.f32 %v2654_v56, %v1196_v3  ;;  %v1221_v43 = vmul.f32 %v2656_v57, %v1196_v3  ;;  %v1774_v56 = vld [vmem:[#allocation8 + $0x18] ss:$0 sm:$0xff]  ;;  %v1785_v27 = vld [vmem:[#allocation8 + $0xd] ss:$0 sm:$0xff] }
 0x1dd   : > { %v1233_v11 = vpop.permute.xlu0 %1232  ;;  %v1191_v49 = vadd.f32 %v1178_v54, %v1160_v46  ;;  %v1215_v58 = vmul.f32 %v1771_v59, %v1198_v33  ;;  %v1192_v17 = vadd.f32 %v1184_v42, %v1161_v30  ;;  %v1214_v47 = vmul.f32 %v1771_v59, %v1196_v3  ;;  %v2943_v33 = vld [vmem:[#allocation18_spill] sm:$0xff]  ;;  %v2944_v3 = vld [vmem:[#allocation21_spill] sm:$0xff] }
 0x1de   : > { %v1225_v16 = vadd.f32 %v1207_v24, %v1188_v25  ;;  %v1230_v13 = vadd.f32 %v1222_v61, %v1193_v15  ;;  %v1224_v48 = vadd.f32 %v1206_v52, %v1187_v14  ;;  %v1243_v20 = vmul.f32 %v2663_v34, %v1233_v11  ;;  %v2945_v14 = vld [vmem:[#allocation16_spill] sm:$0xff] }
 0x1df   : > { %v1235_v63 = vpop.permute.xlu1 %1234  ;;  %v1229_v45 = vadd.f32 %v1221_v43, %v1192_v17  ;;  %v1258_v57 = vmul.f32 %v2941_v0, %v1233_v11  ;;  %v1228_v29 = vadd.f32 %v1215_v58, %v1191_v49  ;;  %v1190_v8 = vadd.f32 %v1177_v18, %v1159_v62 }
 0x1e0   : > { %v1244_v21 = vmul.f32 %v2663_v34, %v1235_v63  ;;  %v1259_v32 = vmul.f32 %v2941_v0, %v1235_v63  ;;  %v1252_v44 = vmul.f32 %v1774_v56, %v1235_v63  ;;  %v1305_v41 = vadd.f32 %v2944_v3, %v1268_v53  ;;  %v1780_v53 = vld [vmem:[#allocation8 + $0x1a] ss:$0 sm:$0xff] }
 0x1e1   : > { %v1272_v9 = vpop.permute.xlu0 %1271  ;;  %v1337_v34 = vadd.f32 %v1319_v2, %v1300_v5  ;;  %v1227_v51 = vadd.f32 %v1214_v47, %v1190_v8  ;;  %v1251_v23 = vmul.f32 %v1774_v56, %v1233_v11  ;;  %v1261_v12 = vadd.f32 %v1243_v20, %v1224_v48  ;;  %v1783_v47 = vld [vmem:[#allocation8 + $0x1b] ss:$0 sm:$0xff]  ;;  %v1787_v56 = vld [vmem:[#allocation8 + $0x2b] ss:$0 sm:$0xff] }
 0x1e2   : > { %v1262_v55 = vadd.f32 %v1244_v21, %v1225_v16  ;;  %v1281_v40 = vmul.f32 %v2942_v28, %v1272_v9  ;;  %v1267_v31 = vadd.f32 %v1259_v32, %v1230_v13  ;;  %v1296_v36 = vmul.f32 %v2943_v33, %v1272_v9 }
 0x1e3   : > { %v1270_v39 = vpop.permute.xlu1 %1269  ;;  %v1266_v18 = vadd.f32 %v1258_v57, %v1229_v45  ;;  %v1265_v46 = vadd.f32 %v1252_v44, %v1228_v29  ;;  %v1289_v30 = vmul.f32 %v1777_v1, %v1272_v9  ;;  %v1393_v21 = vmul.f32 %v1785_v27, %v2945_v14 }
 0x1e4   : > { %v1280_v37 = vmul.f32 %v2942_v28, %v1270_v39  ;;  %v1295_v22 = vmul.f32 %v2943_v33, %v1270_v39  ;;  %v1299_v54 = vadd.f32 %v1281_v40, %v1262_v55  ;;  %v1288_v25 = vmul.f32 %v1777_v1, %v1270_v39  ;;  %v1788_v55 = vld [vmem:[#allocation8 + $0xe] ss:$0 sm:$0xff]  ;;  %v1790_v28 = vld [vmem:[#allocation8 + $0x2c] ss:$0 sm:$0xff] }
 0x1e5   : > { %v1307_v38 = vpop.permute.xlu0 %1306  ;;  %v1304_v59 = vadd.f32 %v1296_v36, %v1267_v31  ;;  %v1371_v10 = vmul.f32 %v1784_v4, %v2639_v35  ;;  %v1264_v5 = vadd.f32 %v1251_v23, %v1227_v51  ;;  %v1302_v17 = vadd.f32 %v1289_v30, %v1265_v46 }
 0x1e6   : > { %v1298_v52 = vadd.f32 %v1280_v37, %v1261_v12  ;;  %v1303_v63 = vadd.f32 %v1295_v22, %v1266_v18  ;;  %v1317_v2 = vmul.f32 %v2733_v26, %v1307_v38  ;;  %v1332_v62 = vmul.f32 %v2737_v50, %v1307_v38  ;;  %v1786_v37 = vld [vmem:[#allocation8 + $0x1c] ss:$0 sm:$0xff]  ;;  %v1789_v18 = vld [vmem:[#allocation8 + $0x1d] ss:$0 sm:$0xff] }
 0x1e7   : > { %v1309_v42 = vpop.permute.xlu1 %1308  ;;  %v1301_v16 = vadd.f32 %v1288_v25, %v1264_v5  ;;  %v1325_v39 = vmul.f32 %v1780_v53, %v1307_v38  ;;  %v1408_v1 = vmul.f32 %v1787_v56, %v2945_v14 }
 0x1e8   : > { %v1318_v19 = vmul.f32 %v2733_v26, %v1309_v42  ;;  %v1333_v15 = vmul.f32 %v2737_v50, %v1309_v42  ;;  %v1326_v24 = vmul.f32 %v1780_v53, %v1309_v42  ;;  %v1342_v26 = vadd.f32 %v2751_v60, %v1305_v41 }
 0x1e9   : > { %v1346_v11 = vpop.permute.xlu0 %1345  ;;  %v1374_v50 = vadd.f32 %v2714_v6, %v1337_v34  ;;  %v1335_v13 = vadd.f32 %v1317_v2, %v1298_v52  ;;  %v1340_v45 = vadd.f32 %v1332_v62, %v1303_v63  ;;  %v1338_v42 = vadd.f32 %v1325_v39, %v1301_v16 }
 0x1ea   : > { %v1336_v43 = vadd.f32 %v1318_v19, %v1299_v54  ;;  %v1355_v49 = vmul.f32 %v2705_v7, %v1346_v11  ;;  %v1341_v0 = vadd.f32 %v1333_v15, %v1304_v59  ;;  %v1370_v32 = vmul.f32 %v1784_v4, %v1346_v11 }
 0x1eb   : > { %v1344_v61 = vpop.permute.xlu1 %1343  ;;  %v1339_v20 = vadd.f32 %v1326_v24, %v1302_v17  ;;  %v1363_v40 = vmul.f32 %v1783_v47, %v1346_v11  ;;  %v1379_v33 = vadd.f32 %v1371_v10, %v1342_v26  ;;  %v1411_v54 = vadd.f32 %v1393_v21, %v1374_v50 }
 0x1ec   : > { %v1354_v58 = vmul.f32 %v2705_v7, %v1344_v61  ;;  %v1369_v9 = vmul.f32 %v1784_v4, %v1344_v61  ;;  %v1373_v35 = vadd.f32 %v1355_v49, %v1336_v43  ;;  %v1378_v60 = vadd.f32 %v1370_v32, %v1341_v0 }
 0x1ed   : > { %v1381_v48 = vpop.permute.xlu0 %1380  ;;  %v1362_v36 = vmul.f32 %v1783_v47, %v1344_v61  ;;  %v1416_v52 = vadd.f32 %v1408_v1, %v1379_v33  ;;  %v1791_v47 = vld [vmem:[%s2888_s4] ss:$0 sm:$0xff] }
 0x1ee   : > { %v1372_v44 = vadd.f32 %v1354_v58, %v1335_v13  ;;  %v1391_v7 = vmul.f32 %v1785_v27, %v1381_v48  ;;  %v1377_v31 = vadd.f32 %v1369_v9, %v1340_v45  ;;  %v1406_v6 = vmul.f32 %v1787_v56, %v1381_v48 }
 0x1ef   : > { %v1383_v57 = vpop.permute.xlu1 %1382  ;;  %v1375_v25 = vadd.f32 %v1362_v36, %v1338_v42  ;;  %v1399_v15 = vmul.f32 %v1786_v37, %v1381_v48  ;;  %v1794_v36 = vld [vmem:[%s2889_s5 + $0x2] ss:$0 sm:$0xff] }
 0x1f0   : > { %v1392_v29 = vmul.f32 %v1785_v27, %v1383_v57  ;;  %v1407_v8 = vmul.f32 %v1787_v56, %v1383_v57  ;;  %v1400_v3 = vmul.f32 %v1786_v37, %v1383_v57  ;;  %v1409_v12 = vadd.f32 %v1391_v7, %v1372_v44 }
 0x1f1   : > { %v1420_v38 = vpop.permute.xlu0 %1419  ;;  %v1376_v27 = vadd.f32 %v1363_v40, %v1339_v20  ;;  %v1414_v4 = vadd.f32 %v1406_v6, %v1377_v31  ;;  %v1412_v21 = vadd.f32 %v1399_v15, %v1375_v25  ;;  %v1792_v31 = vld [vmem:[%s2889_s5] ss:$0 sm:$0xff] }
 0x1f2   : > { %v1410_v22 = vadd.f32 %v1392_v29, %v1373_v35  ;;  %v1415_v41 = vadd.f32 %v1407_v8, %v1378_v60  ;;  %v1429_v34 = vmul.f32 %v1788_v55, %v1420_v38  ;;  %v1444_v51 = vmul.f32 %v1790_v28, %v1420_v38  ;;  %v1793_v60 = vld [vmem:[%s2889_s5 + $0x1] ss:$0 sm:$0xff] }
 0x1f3   : > { %v1418_v23 = vpop.permute.xlu1 %1417  ;;  %v1413_v63 = vadd.f32 %v1400_v3, %v1376_v27  ;;  %v1437_v53 = vmul.f32 %v1789_v18, %v1420_v38 }
 0x1f4   : > { %v1428_v46 = vmul.f32 %v1788_v55, %v1418_v23  ;;  %v1443_v19 = vmul.f32 %v1790_v28, %v1418_v23  ;;  %v1447_v30 = vadd.f32 %v1429_v34, %v1410_v22  ;;  %v1452_v2 = vadd.f32 %v1444_v51, %v1415_v41 }
 0x1f5   : > { %v1436_v14 = vmul.f32 %v1789_v18, %v1418_v23  ;;  %v1450_v0 = vadd.f32 %v1437_v53, %v1413_v63  ;;  %v1795_v23 = vld [vmem:[%s2889_s5 + $0x3] ss:$0 sm:$0xff] }
 0x1f6   : > { %v1446_v59 = vadd.f32 %v1428_v46, %v1409_v12  ;;  %v1451_v11 = vadd.f32 %v1443_v19, %v1414_v4  ;;  %v1455_v24 = vrot.slane %v1447_v30, 7  ;;  %v1462_v32 = vrot.slane %v1452_v2, 1  ;;  %v1796_v46 = vld [vmem:[%s2889_s5 + $0x4] ss:$0 sm:$0xff] }
 0x1f7   : > { %v1422_v62 = vpop.permute.xlu1 %1421  ;;  %v1449_v16 = vadd.f32 %v1436_v14, %v1412_v21 }
 0x1f8   : > { %v1454_v43 = vrot.slane %v1446_v59, 7  ;;  %v1430_v49 = vmul.f32 %v1788_v55, %v1422_v62  ;;  %v1445_v61 = vmul.f32 %v1790_v28, %v1422_v62  ;;  %v1461_v9 = vrot.slane %v1451_v11, 1  ;;  %v1798_v62 = vld [vmem:[%s2889_s5 + $0x6] ss:$0 sm:$0xff] }
 0x1fa   : > { %v1457_v5 = vsel %vm884_vm2, %v1454_v43, %v1455_v24  ;;  %v1448_v58 = vadd.f32 %v1430_v49, %v1411_v54  ;;  %v1453_v17 = vadd.f32 %v1445_v61, %v1416_v52  ;;  %v1465_v20 = vsel %vm892_vm3, %v1461_v9, %v1462_v32  ;;  %v1797_v54 = vld [vmem:[%s2889_s5 + $0x5] ss:$0 sm:$0xff] }
 0x1fb   : > { %v1460_v13 = vadd.f32 %v1457_v5, %v1450_v0  ;;  %v1799_v5 = vld [vmem:[%s2890_s6] ss:$0 sm:$0xff] }
 0x1fc   : > { %v1456_v26 = vrot.slane %v1448_v58, 7  ;;  %v1463_v50 = vrot.slane %v1453_v17, 1 }
 0x1fe   : > { %v1458_v48 = vsel %vm884_vm2, %v1456_v26, %v1454_v43  ;;  %v1464_v56 = vsel %vm892_vm3, %v1462_v32, %v1463_v50  ;;  %v2948_v26 = vld [vmem:[#allocation14_spill] sm:$0xff] }
 0x1ff   : > { %v1459_v39 = vadd.f32 %v1458_v48, %v1449_v16  ;;  %v1467_v45 = vadd.f32 %v1464_v56, %v1460_v13  ;;  %v2949_v13 = vld [vmem:[#allocation13_spill] sm:$0xff] }
 0x201   : > { %v1466_v35 = vadd.f32 %v1465_v20, %v1459_v39  ;;  %v1476_v57 = vadd.f32 %v1791_v47, %v1467_v45 }
 0x203   : > { %v1475_v44 = vadd.f32 %v1791_v47, %v1466_v35  ;;  %v1478_v7 = vmax.f32 %v1476_v57, 0.0 }
 0x205   : > { %v1477_v29 = vmax.f32 %v1475_v44, 0.0  ;;  %1480 = vst.msk [vmem:[#allocation2 + $0x8] sm:$0xff] %vm332_vm1, %v1478_v7 }
 0x207   : > { %1479 = vst.msk [vmem:[#allocation2] sm:$0xff] %vm332_vm1, %v1477_v29 }
 0x20c   : > { %v1482_v8 = vld [vmem:[#allocation2 + $0x8] sm:$0xff] }
 0x20d   : > { %1485 = vrot.lane.b32.xlu1 %v1482_v8, %s2062_s10  ;;  %v1526_v4 = vmul.f32 %v1795_v23, %v1482_v8 }
 0x20e   : > { %v1481_v55 = vld [vmem:[#allocation2] sm:$0xff] }
 0x20f   : > { %1483 = vrot.lane.b32.xlu0 %v1481_v55, %s2062_s10  ;;  %v1525_v59 = vmul.f32 %v1795_v23, %v1481_v55  ;;  %s1986_s10 = scalar_lea.vmem %s1985_s11, 512 }
 0x211   : > { %1496 = vrot.lane.b32.xlu1 %v1482_v8, %s2063_s15 }
 0x213   : > { %1494 = vrot.lane.b32.xlu0 %v1481_v55, %s2063_s15 }
 0x215   : > { %1509 = vrot.lane.b32.xlu1 %v1482_v8, %s2064_s19 }
 0x217   : > { %1507 = vrot.lane.b32.xlu0 %v1481_v55, %s2064_s19  ;;  %s1806_s19 = sshll.u32 %s2136_s28, 8  ;;  %s1582_s28 = scalar_lea.sflag [#allocation5], %s2296_s20 }
 0x218   : > { %s2835_s9 = scalar_lea.hbm %s2891_s7, %s1806_s19 }
 0x219   : > { %1531 = vrot.lane.b32.xlu1 %v1482_v8, %s2065_s14 }
 0x21b   : > { %1529 = vrot.lane.b32.xlu0 %v1481_v55, %s2065_s14  ;;  %s2947_s14 = sshll.u32 %s2296_s20, 4 }
 0x21c   : > { %s325_s13 = scalar_lea.vmem [#allocation9], %s2947_s14 }
 0x21d   : > { %1544 = vrot.lane.b32.xlu1 %v1482_v8, %s2929_s21 }
 0x21f   : > { %1542 = vrot.lane.b32.xlu0 %v1481_v55, %s2929_s21  ;;  %s1595_s21 = sshll.u32 %s325_s13, 4  ;;  %s2837_s21 = int_to_ptr.vmem [resolvable:$true] %s1595_s21 }
 0x220   : > { %s1980_s30 = scalar_lea.vmem %s2837_s21, 256  ;;  %p1987_p7 = scmp.lt.s32.totalorder %s2837_s21, %s1985_s11 }
 0x221   : > { %1557 = vrot.lane.b32.xlu1 %v1482_v8, %s2067_s23  ;;  %p1981_p11 = scmp.ne.s32.totalorder %s2837_s21, %s1980_s30  ;;  %p1988_p9 = scmp.lt.s32.totalorder %s1986_s10, %s1980_s30 }
 0x223   : > { %1555 = vrot.lane.b32.xlu0 %v1481_v55, %s2067_s23  ;;  %p1982_p2 = pnand %p1981_p11, %p2950_p0  ;;  %p1989_p12 = por %p1988_p9, %p1987_p7 }
 0x225   : > { %p1983_p3 = pneg %p1982_p2 }
 0x227   : > { %p1990_p1 = pnand %p1989_p12, %p1983_p3 }
 0x27f   : > { %v1486_v28 = vpop.permute.xlu1 %1485 }
 0x280   : > { %v1493_v37 = vmul.f32 %v1792_v31, %v1486_v28 }
 0x281   : > { %v1484_v40 = vpop.permute.xlu0 %1483 }
 0x282   : > { %v1492_v3 = vmul.f32 %v1792_v31, %v1484_v40 }
 0x283   : > { %v1497_v6 = vpop.permute.xlu1 %1496 }
 0x284   : > { %v1504_v1 = vmul.f32 %v1793_v60, %v1497_v6 }
 0x285   : > { %v1495_v33 = vpop.permute.xlu0 %1494 }
 0x286   : > { %v1503_v22 = vmul.f32 %v1793_v60, %v1495_v33  ;;  %v1506_v41 = vadd.f32 %v1504_v1, %v1493_v37 }
 0x287   : > { %v1510_v38 = vpop.permute.xlu1 %1509 }
 0x288   : > { %v1517_v34 = vmul.f32 %v1794_v36, %v1510_v38  ;;  %v1505_v42 = vadd.f32 %v1503_v22, %v1492_v3 }
 0x289   : > { %v1508_v51 = vpop.permute.xlu0 %1507 }
 0x28a   : > { %v1519_v12 = vadd.f32 %v1517_v34, %v1506_v41  ;;  %v1516_v18 = vmul.f32 %v1794_v36, %v1508_v51 }
 0x28b   : > { %v1532_v19 = vpop.permute.xlu1 %1531 }
 0x28c   : > { %v1518_v27 = vadd.f32 %v1516_v18, %v1505_v42  ;;  %v1528_v25 = vadd.f32 %v1526_v4, %v1519_v12  ;;  %v1539_v15 = vmul.f32 %v1796_v46, %v1532_v19 }
 0x28d   : > { %v1530_v30 = vpop.permute.xlu0 %1529 }
 0x28e   : > { %v1527_v63 = vadd.f32 %v1525_v59, %v1518_v27  ;;  %v1538_v53 = vmul.f32 %v1796_v46, %v1530_v30  ;;  %v1541_v24 = vadd.f32 %v1539_v15, %v1528_v25 }
 0x28f   : > { %v1545_v52 = vpop.permute.xlu1 %1544 }
 0x290   : > { %v1552_v2 = vmul.f32 %v1797_v54, %v1545_v52  ;;  %v1540_v61 = vadd.f32 %v1538_v53, %v1527_v63 }
 0x291   : > { %v1543_v11 = vpop.permute.xlu0 %1542 }
 0x292   : > { %v1551_v43 = vmul.f32 %v1797_v54, %v1543_v11  ;;  %v1554_v14 = vadd.f32 %v1552_v2, %v1541_v24 }
 0x293   : > { %v1558_v49 = vpop.permute.xlu1 %1557 }
 0x294   : > { %v1565_v10 = vmul.f32 %v1798_v62, %v1558_v49  ;;  %v1553_v17 = vadd.f32 %v1551_v43, %v1540_v61 }
 0x295   : > { %v1556_v58 = vpop.permute.xlu0 %1555 }
 0x296   : > { %v1567_v21 = vadd.f32 %v1565_v10, %v1554_v14  ;;  %v1564_v0 = vmul.f32 %v1798_v62, %v1556_v58 }
 0x298   : > { %v1576_v32 = vadd.f32 %v1799_v5, %v1567_v21  ;;  %v1566_v9 = vadd.f32 %v1564_v0, %v1553_v17 }
 0x29a   : > { %v1578_v50 = vadd.f32 %v1576_v32, %v2948_v26  ;;  %v1575_v16 = vadd.f32 %v1799_v5, %v1566_v9 }
 0x29c   : > { %1580 = vst.msk [vmem:[%s325_s13 + $0x8] sm:$0xff] %vm332_vm1, %v1578_v50  ;;  %v1577_v47 = vadd.f32 %v1575_v16, %v2949_v13 }
 0x29e   : > { %1579 = vst.msk [vmem:[%s325_s13] sm:$0xff] %vm332_vm1, %v1577_v47 }
 0x29f   : > { %1993 = shalt.err (!%p1990_p1)
}
 0x2a0   : > { %s1994_s15 = scalar_lea.hbm %s2835_s9, 256  ;;  %s1998_s14 = scalar_lea.hbm %s2891_s7, 512 }
 0x2a1   : > { %p1995_p13 = scmp.ne.s32.totalorder %s2835_s9, %s1994_s15  ;;  %p1999_p4 = scmp.lt.u32.totalorder %s2835_s9, %s2891_s7 }
 0x2a2   : > { %p2000_p5 = scmp.lt.u32.totalorder %s1998_s14, %s1994_s15  ;;  %p2002_p11 = scmp.lt.u32.totalorder %s1994_s15, %s2835_s9 }
 0x2a3   : > { %p1996_p6 = pnand %p1995_p13, %p2950_p0 }
 0x2a4   : > { %p2001_p8 = por %p2000_p5, %p1999_p4 }
 0x2a5   : > { %p1997_p10 = pneg %p1996_p6 }
 0x2a6   : > { %p2003_p2 = por %p2002_p11, %p2001_p8 }
 0x2a8   : > { %p2004_p3 = pnand %p2003_p2, %p1997_p10 }
 0x2aa   : > { %2007 = shalt.err (!%p2004_p3)
}
 0x2ab   : > { %s2073_s22 = smov 128   ;;  %s2074_s30 = smov 8  }
 0x2ac   : > { %1817 = dma.vmem_to_hbm [thread:$0]  (%p2950_p0), %s2837_s21, 256, %s2835_s9, %s1582_s28, %s2073_s22, %s2073_s22, %s2074_s30  }
 0x2ad PF: > { %s1610_s29 = sand.u32 1, %s2038_s24   ;;  %p2951_p7 = scmp.ne.s32.totalorder %s2917_s8, 0 }
 0x2ae   : > { %p2952_p9 = scmp.ge.s32.totalorder %s2050_s27, 2  ;;  %s1611_s11 = scalar_lea.sflag [#allocation5], %s1610_s29 }
 0x2b0   : > { %p1831_p12 = pnand %p2952_p9, %p2951_p7 }
 0x2b2   : > { %2033 = dma.done.wait (!%p1831_p12), %s1611_s11, 256  }
 0x2b3   : > { %2035 = vsyncadd (!%p1831_p12), %s1611_s11, 4294967040  ;;  %p21_p1 = scmp.ge.s32.totalorder %s2231_s12, 4   ;;  %s2953_s24 = smov %s2042_s25 }
 0x2b4   : > { %s2954_s25 = smov %s2046_s26  ;;  %s2955_s26 = smov %s2247_s17 }
 0x2b5   : > { %s2956_s27 = smov %s2231_s12  ;;  %23 = sbr.rel (!%p21_p1) target bundleno = 6 (0x6), region = 101 }
 0x2bc   :  { %1616 = vsyncpa [#allocation4], 1 }
 0x2bd   :  { %1618 = vsyncpa [#allocation4 + $0x1], 1 }
 0x2be   :  { %1619 = vsyncpa [#allocation7], 1 }
 0x2bf   :  { %1620 = vsyncpa [#allocation5], 1 }
 0x2c0   :  { %1622 = vsyncpa [#allocation5 + $0x1], 1 }

</bundles_post_ra>
